<compile_context>
chip_gen: v7x
topology: tpu7x:2x2x1
jax: 0.10.0
libtpu: 0.0.40
codegen_flags: <defaults>
</compile_context>

<pallas_src>
import functools

import jax
import jax.numpy as jnp
from jax.experimental import pallas as pl
from jax.experimental.pallas import tpu as pltpu

# ---- module-consistent (small) shapes ---------------------------------------
B, C, H, W = 2, 4, 16, 16
HWIN = H * W                   # spatial positions folded into the stem
K_STEM = C * HWIN              # 1024 = flattened NCHW image per batch row
F_BACKBONE = 256               # stand-in for resnet50's 2048 backbone features
F_ATTN = F_BACKBONE // 4       # SpatialAttention hidden = in_features // 4
H1, H2 = 128, 64               # stand-in for 1024, 512 in crowd_features
NUM_CLASSES = 1
N_HEADS = 2 + NUM_CLASSES      # fused: count | density | classification

# ---- mega-pack layout (one f32 buffer, 256 lanes, 8-row-aligned blocks) -----
PACK_W = F_BACKBONE                          # 256 lanes = 2 full vregs wide
R_STEM = 0                                   # folded stem   : (C*H*W, 256)
R_BIAS = R_STEM + K_STEM                     # 6 biases x 8 replicated sublanes
BR_STEM, BR_A1, BR_A2, BR_C1, BR_C2, BR_HEAD = range(6)
N_BIAS_ROWS = 6 * 8
R_A1 = R_BIAS + N_BIAS_ROWS                  # attention.0   : (256, 64)
R_A2 = R_A1 + F_BACKBONE                     # attention.2   : (64, 1) lane-replicated
R_C1 = R_A2 + F_BACKBONE                     # crowd_feat.0  : (256, 128)
R_C2 = R_C1 + F_BACKBONE                     # crowd_feat.3  : (128, 64)
R_HEAD = R_C2 + F_BACKBONE                   # fused heads   : (64, 3)
TOTAL_ROWS = R_HEAD + F_BACKBONE             # 2352 rows -> ~2.4 MiB f32 (VMEM-resident)


def _crowd_kernel(x_ref, p_ref, out_ref, *, bp):
    """x_ref: (bp, C*H*W) flattened NCHW image.  p_ref: (TOTAL_ROWS, 256) pack.
    out_ref: (bp, 512) lane-dense slab = [crowd features | fused heads]."""

    def bias(idx):
        r0 = R_BIAS + 8 * idx
        if bp == 8:                              # plain tile-aligned (8, 256) load
            return p_ref[r0:r0 + 8, :]
        return p_ref[pl.ds(r0, bp, stride=0), :]  # sublane-broadcast the bias row

    def dense(v, row0, rows, bias_idx, relu):
        w = p_ref[row0:row0 + rows, :]           # static, tile-aligned VMEM slice
        y = jnp.dot(v, w, preferred_element_type=jnp.float32) + bias(bias_idx)
        return jnp.maximum(y, 0.0) if relu else y

    # ---- backbone stub: GAP folded into a linear stem (pre-scaled + tiled) ---
    # TODO(synk): the real ResNet-50 conv stack has no clean single-kernel
    # Pallas equivalent; this stem only keeps the backbone_features contract.
    x = x_ref[...]                                                   # (bp, 1024)
    feats = dense(x, R_STEM, K_STEM, BR_STEM, relu=True)             # (bp, 256)

    # ---- SpatialAttention: Linear -> ReLU -> Linear -> Sigmoid, then x*gate --
    # wa2/ba2 are replicated across all 256 lanes, so every lane of `gate`
    # already holds the scalar attention weight: no XLU reduce, no broadcast.
    a = dense(feats, R_A1, F_BACKBONE, BR_A1, relu=True)             # (bp, 256)
    gate = jax.nn.sigmoid(dense(a, R_A2, F_BACKBONE, BR_A2, relu=False))
    attended = feats * gate                                          # (bp, 256)

    # ---- crowd_features MLP (Dropout == identity in eval mode) ---------------
    h1 = dense(attended, R_C1, F_BACKBONE, BR_C1, relu=True)         # lanes 0:128 live
    h2 = dense(h1, R_C2, F_BACKBONE, BR_C2, relu=True)               # lanes 0:64  live

    # ---- fused heads: lane 0|1|2 = count | density | classification ----------
    heads = dense(h2, R_HEAD, F_BACKBONE, BR_HEAD, relu=False)       # lanes 0:3 live

    # One lane-dense slab -> full-width unmasked writebacks.
    # (Padded batch rows b..bp-1 carry relu(bias) garbage; never reduce over
    #  the batch dimension inside this kernel.)
    out_ref[:, 0:PACK_W] = h2
    out_ref[:, PACK_W:2 * PACK_W] = heads


def _linear_params(key, fan_in, fan_out):
    """Deterministic PyTorch-Linear-style init: U(-1/sqrt(fan_in), +)."""
    kw, kb = jax.random.split(key)
    bound = 1.0 / jnp.sqrt(float(fan_in))
    w = jax.random.uniform(kw, (fan_in, fan_out), jnp.float32, -bound, bound)
    b = jax.random.uniform(kb, (fan_out,), jnp.float32, -bound, bound)
    return w, b


def init_params(key):
    keys = jax.random.split(key, 8)
    w_stem, b_stem = _linear_params(keys[0], C, F_BACKBONE)      # backbone stub
    wa1, ba1 = _linear_params(keys[1], F_BACKBONE, F_ATTN)       # attention[0]
    wa2, ba2 = _linear_params(keys[2], F_ATTN, 1)                # attention[2]
    wc1, bc1 = _linear_params(keys[3], F_BACKBONE, H1)           # crowd_features[0]
    wc2, bc2 = _linear_params(keys[4], H1, H2)                   # crowd_features[3]
    wcnt, bcnt = _linear_params(keys[5], H2, 1)                  # count_head
    wden, bden = _linear_params(keys[6], H2, 1)                  # density_head
    wcls, bcls = _linear_params(keys[7], H2, NUM_CLASSES)        # classification_head
    return (w_stem, b_stem, wa1, ba1, wa2, ba2, wc1, bc1, wc2, bc2,
            wcnt, bcnt, wden, bden, wcls, bcls)


def pack_params(params):
    """Pack every weight/bias into ONE tile-aligned (TOTAL_ROWS, 256) f32 buffer."""
    (w_stem, b_stem, wa1, ba1, wa2, ba2, wc1, bc1, wc2, bc2,
     wcnt, bcnt, wden, bden, wcls, bcls) = params

    w_heads = jnp.concatenate([wcnt, wden, wcls], axis=1)        # (H2, 3)
    b_heads = jnp.concatenate([bcnt, bden, bcls], axis=0)        # (3,)

    pack = jnp.zeros((TOTAL_ROWS, PACK_W), jnp.float32)

    # Fold the global-average-pool into the stem weight: pre-scale by 1/(H*W)
    # and tile each channel row across its H*W flattened NCHW positions so
    #   x_flat @ w_fold == mean_spatial(x) @ w_stem   (exact identity).
    w_fold = jnp.repeat(w_stem / float(HWIN), HWIN, axis=0)      # (C*H*W, 256)
    pack = pack.at[R_STEM:R_STEM + K_STEM, :].set(w_fold)

    # Layer weights.  Unused ROWS of each slot stay zero, so padded activation
    # lanes can never leak into downstream layers (robust, unlike a lane-sum).
    pack = pack.at[R_A1:R_A1 + F_BACKBONE, :F_ATTN].set(wa1)
    pack = pack.at[R_A2:R_A2 + F_ATTN, :].set(jnp.tile(wa2, (1, PACK_W)))  # lane-replicated
    pack = pack.at[R_C1:R_C1 + F_BACKBONE, :H1].set(wc1)
    pack = pack.at[R_C2:R_C2 + H1, :H2].set(wc2)
    pack = pack.at[R_HEAD:R_HEAD + H2, :N_HEADS].set(w_heads)

    # Biases, replicated across 8 sublanes so the kernel adds them with a plain
    # tile-aligned load (no per-layer sublane broadcast).
    def put_bias(pk, idx, val, width):
        r0 = R_BIAS + 8 * idx
        return pk.at[r0:r0 + 8, :width].set(jnp.broadcast_to(val, (8, width)))

    pack = put_bias(pack, BR_STEM, b_stem, F_BACKBONE)
    pack = put_bias(pack, BR_A1, ba1, F_ATTN)
    pack = put_bias(pack, BR_A2, ba2[0], PACK_W)                 # scalar, lane-replicated
    pack = put_bias(pack, BR_C1, bc1, H1)
    pack = put_bias(pack, BR_C2, bc2, H2)
    pack = put_bias(pack, BR_HEAD, b_heads, N_HEADS)
    return pack


@jax.jit
def crowd_detection_forward(x, mega_pack):
    """x: (B, C, H, W) NCHW float32; mega_pack from pack_params().
    Returns the padded (BP, 512) output slab; slice with split_outputs() at the
    consumer (avoids materializing 4 tiny arrays around a dispatch-bound call)."""
    b = x.shape[0]
    bp = ((b + 7) // 8) * 8                       # pad batch to the f32 sublane count
    x_flat = x.reshape(b, -1).astype(jnp.float32)                 # NCHW flatten
    x_pad = jnp.zeros((bp, K_STEM), jnp.float32).at[:b].set(x_flat)

    vmem = pl.BlockSpec(memory_space=pltpu.MemorySpace.VMEM)
    # Gridless single shot: all operands (~2.5 MiB) are VMEM-resident on
    # v5e/v6e/v7x.  Only add a leading batch grid axis with
    # dimension_semantics=("parallel",) once each step carries >= ~256 batch
    # rows, so v7x's second TensorCore pays for the ~0.35 us/step overhead.
    return pl.pallas_call(
        functools.partial(_crowd_kernel, bp=bp),
        out_shape=jax.ShapeDtypeStruct((bp, 2 * PACK_W), jnp.float32),
        in_specs=[vmem, vmem],
        out_specs=vmem,
    )(x_pad, mega_pack)


def split_outputs(slab, batch):
    """Slice the lane-dense kernel slab into the module's output dict."""
    return {
        "count": slab[:batch, PACK_W + 0:PACK_W + 1],
        "density": slab[:batch, PACK_W + 1:PACK_W + 2],
        "classification": slab[:batch, PACK_W + 2:PACK_W + 2 + NUM_CLASSES],
        "features": slab[:batch, :H2],
    }


def _reference_forward(x, params):
    """Pure-JAX reference with the same (stubbed-backbone) semantics, run at
    float32 matmul precision so the comparison is against near-exact math."""
    (w_stem, b_stem, wa1, ba1, wa2, ba2, wc1, bc1, wc2, bc2,
     wcnt, bcnt, wden, bden, wcls, bcls) = params
    with jax.default_matmul_precision("float32"):
        pooled = jnp.mean(x.reshape(x.shape[0], x.shape[1], -1), axis=-1)
        feats = jax.nn.relu(pooled @ w_stem + b_stem)
        attn_w = jax.nn.sigmoid(jax.nn.relu(feats @ wa1 + ba1) @ wa2 + ba2)
        attended = feats * attn_w
        h2 = jax.nn.relu(jax.nn.relu(attended @ wc1 + bc1) @ wc2 + bc2)
        return {"count": h2 @ wcnt + bcnt, "density": h2 @ wden + bden,
                "classification": h2 @ wcls + bcls, "features": h2}


if __name__ == "__main__":
    key = jax.random.PRNGKey(0)
    kx, kp = jax.random.split(key)
    x = jax.random.normal(kx, (B, C, H, W), dtype=jnp.float32)
    params = init_params(kp)
    mega_pack = pack_params(params)

    slab = crowd_detection_forward(x, mega_pack)
    jax.block_until_ready(slab)
    out = split_outputs(slab, B)

    assert out["count"].shape == (B, 1)
    assert out["density"].shape == (B, 1)
    assert out["classification"].shape == (B, NUM_CLASSES)
    assert out["features"].shape == (B, H2)

    ref = _reference_forward(x, params)
    # 2e-3 is sized for the MXU's f32 pass ordering plus the (exact-in-real-
    # arithmetic) GAP-fold re-association, while still tight enough that an
    # accidental bf16 cast of the pack would trip it.  All-f32 path today.
    for k in ("count", "density", "classification", "features"):
        assert jnp.allclose(out[k], ref[k], rtol=2e-3, atol=2e-3), k

    print("KERNEL_OK")
</pallas_src>

<mosaic_0001>
module attributes {stable_mosaic.version = 11 : i64} {
  func.func @_crowd_kernel(%arg0: memref<8x1024xf32, #tpu.memory_space<vmem>>, %arg1: memref<2352x256xf32, #tpu.memory_space<vmem>>, %arg2: memref<8x512xf32, #tpu.memory_space<vmem>>) attributes {dimension_semantics = [], scalar_prefetch = 0 : i64, scratch_operands = 0 : i64, tpu.core_type = #tpu.core_type<tc>} {
    %c0 = arith.constant 0 : index
    %c0_0 = arith.constant 0 : index
    %0 = vector.load %arg0[%c0, %c0_0] : memref<8x1024xf32, #tpu.memory_space<vmem>>, vector<8x1024xf32>
    %c0_1 = arith.constant 0 : index
    %c0_2 = arith.constant 0 : index
    %1 = vector.load %arg1[%c0_1, %c0_2] : memref<2352x256xf32, #tpu.memory_space<vmem>>, vector<1024x256xf32>
    %cst = arith.constant dense<0.000000e+00> : vector<8x256xf32>
    %2 = tpu.matmul %0, %1, %cst {dimension_numbers = #tpu.dot_dimension_numbers<[1], [0], [0], [1], [0, 0, 1, 1], [], []>} : vector<8x1024xf32>, vector<1024x256xf32>, vector<8x256xf32> -> vector<8x256xf32>
    %c1024 = arith.constant 1024 : index
    %c0_3 = arith.constant 0 : index
    %3 = vector.load %arg1[%c1024, %c0_3] : memref<2352x256xf32, #tpu.memory_space<vmem>>, vector<8x256xf32>
    %4 = arith.addf %2, %3 : vector<8x256xf32>
    %cst_4 = arith.constant 0.000000e+00 : f32
    %5 = vector.broadcast %cst_4 : f32 to vector<8x256xf32>
    %6 = arith.maximumf %4, %5 : vector<8x256xf32>
    %c1072 = arith.constant 1072 : index
    %c0_5 = arith.constant 0 : index
    %7 = vector.load %arg1[%c1072, %c0_5] : memref<2352x256xf32, #tpu.memory_space<vmem>>, vector<256x256xf32>
    %cst_6 = arith.constant dense<0.000000e+00> : vector<8x256xf32>
    %8 = tpu.matmul %6, %7, %cst_6 {dimension_numbers = #tpu.dot_dimension_numbers<[1], [0], [0], [1], [0, 0, 1, 1], [], []>} : vector<8x256xf32>, vector<256x256xf32>, vector<8x256xf32> -> vector<8x256xf32>
    %c1032 = arith.constant 1032 : index
    %c0_7 = arith.constant 0 : index
    %9 = vector.load %arg1[%c1032, %c0_7] : memref<2352x256xf32, #tpu.memory_space<vmem>>, vector<8x256xf32>
    %10 = arith.addf %8, %9 : vector<8x256xf32>
    %cst_8 = arith.constant 0.000000e+00 : f32
    %11 = vector.broadcast %cst_8 : f32 to vector<8x256xf32>
    %12 = arith.maximumf %10, %11 : vector<8x256xf32>
    %c1328 = arith.constant 1328 : index
    %c0_9 = arith.constant 0 : index
    %13 = vector.load %arg1[%c1328, %c0_9] : memref<2352x256xf32, #tpu.memory_space<vmem>>, vector<256x256xf32>
    %cst_10 = arith.constant dense<0.000000e+00> : vector<8x256xf32>
    %14 = tpu.matmul %12, %13, %cst_10 {dimension_numbers = #tpu.dot_dimension_numbers<[1], [0], [0], [1], [0, 0, 1, 1], [], []>} : vector<8x256xf32>, vector<256x256xf32>, vector<8x256xf32> -> vector<8x256xf32>
    %c1040 = arith.constant 1040 : index
    %c0_11 = arith.constant 0 : index
    %15 = vector.load %arg1[%c1040, %c0_11] : memref<2352x256xf32, #tpu.memory_space<vmem>>, vector<8x256xf32>
    %16 = arith.addf %14, %15 : vector<8x256xf32>
    %17 = arith.negf %16 : vector<8x256xf32>
    %18 = math.exp %17 : vector<8x256xf32>
    %cst_12 = arith.constant 1.000000e+00 : f32
    %19 = vector.broadcast %cst_12 : f32 to vector<8x256xf32>
    %20 = arith.addf %19, %18 : vector<8x256xf32>
    %21 = arith.divf %19, %20 : vector<8x256xf32>
    %22 = arith.mulf %6, %21 : vector<8x256xf32>
    %c1584 = arith.constant 1584 : index
    %c0_13 = arith.constant 0 : index
    %23 = vector.load %arg1[%c1584, %c0_13] : memref<2352x256xf32, #tpu.memory_space<vmem>>, vector<256x256xf32>
    %cst_14 = arith.constant dense<0.000000e+00> : vector<8x256xf32>
    %24 = tpu.matmul %22, %23, %cst_14 {dimension_numbers = #tpu.dot_dimension_numbers<[1], [0], [0], [1], [0, 0, 1, 1], [], []>} : vector<8x256xf32>, vector<256x256xf32>, vector<8x256xf32> -> vector<8x256xf32>
    %c1048 = arith.constant 1048 : index
    %c0_15 = arith.constant 0 : index
    %25 = vector.load %arg1[%c1048, %c0_15] : memref<2352x256xf32, #tpu.memory_space<vmem>>, vector<8x256xf32>
    %26 = arith.addf %24, %25 : vector<8x256xf32>
    %cst_16 = arith.constant 0.000000e+00 : f32
    %27 = vector.broadcast %cst_16 : f32 to vector<8x256xf32>
    %28 = arith.maximumf %26, %27 : vector<8x256xf32>
    %c1840 = arith.constant 1840 : index
    %c0_17 = arith.constant 0 : index
    %29 = vector.load %arg1[%c1840, %c0_17] : memref<2352x256xf32, #tpu.memory_space<vmem>>, vector<256x256xf32>
    %cst_18 = arith.constant dense<0.000000e+00> : vector<8x256xf32>
    %30 = tpu.matmul %28, %29, %cst_18 {dimension_numbers = #tpu.dot_dimension_numbers<[1], [0], [0], [1], [0, 0, 1, 1], [], []>} : vector<8x256xf32>, vector<256x256xf32>, vector<8x256xf32> -> vector<8x256xf32>
    %c1056 = arith.constant 1056 : index
    %c0_19 = arith.constant 0 : index
    %31 = vector.load %arg1[%c1056, %c0_19] : memref<2352x256xf32, #tpu.memory_space<vmem>>, vector<8x256xf32>
    %32 = arith.addf %30, %31 : vector<8x256xf32>
    %cst_20 = arith.constant 0.000000e+00 : f32
    %33 = vector.broadcast %cst_20 : f32 to vector<8x256xf32>
    %34 = arith.maximumf %32, %33 : vector<8x256xf32>
    %c2096 = arith.constant 2096 : index
    %c0_21 = arith.constant 0 : index
    %35 = vector.load %arg1[%c2096, %c0_21] : memref<2352x256xf32, #tpu.memory_space<vmem>>, vector<256x256xf32>
    %cst_22 = arith.constant dense<0.000000e+00> : vector<8x256xf32>
    %36 = tpu.matmul %34, %35, %cst_22 {dimension_numbers = #tpu.dot_dimension_numbers<[1], [0], [0], [1], [0, 0, 1, 1], [], []>} : vector<8x256xf32>, vector<256x256xf32>, vector<8x256xf32> -> vector<8x256xf32>
    %c1064 = arith.constant 1064 : index
    %c0_23 = arith.constant 0 : index
    %37 = vector.load %arg1[%c1064, %c0_23] : memref<2352x256xf32, #tpu.memory_space<vmem>>, vector<8x256xf32>
    %38 = arith.addf %36, %37 : vector<8x256xf32>
    %c0_24 = arith.constant 0 : index
    %c0_25 = arith.constant 0 : index
    %39 = vector.load %arg2[%c0_24, %c0_25] : memref<8x512xf32, #tpu.memory_space<vmem>>, vector<8x256xf32>
    tpu.vector_store %arg2[%c0_24, %c0_25], %34 {strides = array<i32>} : memref<8x512xf32, #tpu.memory_space<vmem>>, vector<8x256xf32>,
    %c0_26 = arith.constant 0 : index
    %c256 = arith.constant 256 : index
    %40 = vector.load %arg2[%c0_26, %c256] : memref<8x512xf32, #tpu.memory_space<vmem>>, vector<8x256xf32>
    tpu.vector_store %arg2[%c0_26, %c256], %38 {strides = array<i32>} : memref<8x512xf32, #tpu.memory_space<vmem>>, vector<8x256xf32>,
    return
  }
}

</mosaic_0001>

<bundles_post_ra>
// kernel: crowd_detection_forward.1
= control target key start
LH: loop header
LB: loop body
LE: loop exit
PB: predicated region body
PF: predicated region fallthrough
CT: control target
= control target key end

     0   :  { %7 = vsyncpa [#allocation3], 0  ;;  %s2029_s0 = inlined_call_operand.vmem [shape: f32[8,1024], index: 0, kind: input, shape index: {}]   ;;  %s2030_s1 = inlined_call_operand.hbm [shape: f32[2352,256], index: 1, kind: input, shape index: {}]   ;;  %s2031_s2 = inlined_call_operand.hbm [shape: f32[8,512], index: 2, kind: output, shape index: {}]  }
   0x1   :  { %8 = vsyncpa [#allocation4], 0  ;;  %s1948_s9 = smov [#allocation2]   ;;  %s1900_s13 = scalar_lea.hbm %s2030_s1, 75264 }
   0x2   :  { %s16_s10 = sshll.u32 %s1948_s9, 4  ;;  %p1901_p0 = scmp.ne.s32.totalorder %s2030_s1, %s1900_s13  ;;  %s17_s10 = int_to_ptr.vmem [resolvable:$true] %s16_s10 }
   0x3   :  { %p1904_p1 = scmp.lt.u32.totalorder %s1900_s13, %s2030_s1 }
   0x5   :  { %p1906_p2 = pnand %p1904_p1, %p1901_p0 }
   0x7   :  { %1909 = shalt.err (!%p1906_p2)
}
   0x8   :  { %s1910_s18 = scalar_lea.vmem %s17_s10, 75264  ;;  %p1915_p4 = scmp.lt.s32.totalorder %s17_s10, %s17_s10 }
   0x9   :  { %p1911_p3 = scmp.ne.s32.totalorder %s17_s10, %s1910_s18  ;;  %p1916_p5 = scmp.lt.s32.totalorder %s1910_s18, %s1910_s18 }
   0xb   :  { %p1917_p6 = por %p1916_p5, %p1915_p4 }
   0xd   :  { %p1918_p7 = pnand %p1917_p6, %p1911_p3 }
   0xf   :  { %1921 = shalt.err (!%p1918_p7)
}
  0x10   :  { %s1949_s19 = smov 256   ;;  %s1950_s20 = smov 16  }
  0x11   :  { %22 = dma.hbm_to_vmem [thread:$0]  %s2030_s1, 75264, %s17_s10, [#allocation3], %s1949_s19, %s1949_s19, %s1950_s20  }
  0x12   :  { %1944 = dma.done.wait [#allocation3], 75264  }
  0x13   :  { %1945 = vsyncadd [#allocation3], 4294892032  ;;  %v35_v0 = vld [vmem:[#allocation2 + $0x8] sm:$0xff]  ;;  %v37_v1 = vld [vmem:[#allocation2 + $0x18] sm:$0xff] }
  0x14   :  { %v34_v2 = vld [vmem:[#allocation2] sm:$0xff]  ;;  %v1304_v3 = vpack.c.bf16 %v37_v1, %v35_v0  ;;  %v36_v4 = vld [vmem:[#allocation2 + $0x10] sm:$0xff]  ;;  %v39_v5 = vld [vmem:[#allocation2 + $0x28] sm:$0xff] }
  0x15   :  { %v41_v6 = vld [vmem:[#allocation2 + $0x38] sm:$0xff]  ;;  %v1306_v7 = vpack.c.bf16 %v36_v4, %v34_v2  ;;  %v38_v9 = vld [vmem:[#allocation2 + $0x20] sm:$0xff]  ;;  %v40_v10 = vld [vmem:[#allocation2 + $0x30] sm:$0xff] }
  0x16   :  { %v1308_v8 = vpack.c.bf16 %v41_v6, %v39_v5  ;;  %v43_v11 = vld [vmem:[#allocation2 + $0x48] sm:$0xff]  ;;  %1305 = vmatprep.subr.bf16.mxu0 %v1304_v3  ;;  %v45_v12 = vld [vmem:[#allocation2 + $0x58] sm:$0xff]  ;;  %v1310_v13 = vpack.c.bf16 %v40_v10, %v38_v9  ;;  %v42_v15 = vld [vmem:[#allocation2 + $0x40] sm:$0xff] }
  0x17   :  { %1307 = vmatpush1.bf16.msra.mxu0 %v1306_v7  ;;  %v1312_v14 = vpack.c.bf16 %v45_v12, %v43_v11  ;;  %v44_v16 = vld [vmem:[#allocation2 + $0x50] sm:$0xff]  ;;  %v47_v17 = vld [vmem:[#allocation2 + $0x68] sm:$0xff]  ;;  %v49_v18 = vld [vmem:[#allocation2 + $0x78] sm:$0xff] }
  0x18   :  { %1309 = vmatprep.subr.bf16.mxu0 %v1308_v8  ;;  %v1314_v19 = vpack.c.bf16 %v44_v16, %v42_v15  ;;  %v1316_v20 = vpack.c.bf16 %v49_v18, %v47_v17  ;;  %v46_v21 = vld [vmem:[#allocation2 + $0x60] sm:$0xff]  ;;  %v48_v22 = vld [vmem:[#allocation2 + $0x70] sm:$0xff]  ;;  %v51_v23 = vld [vmem:[#allocation2 + $0x88] sm:$0xff] }
  0x19   :  { %v53_v24 = vld [vmem:[#allocation2 + $0x98] sm:$0xff]  ;;  %v1318_v25 = vpack.c.bf16 %v48_v22, %v46_v21  ;;  %v50_v27 = vld [vmem:[#allocation2 + $0x80] sm:$0xff]  ;;  %v52_v28 = vld [vmem:[#allocation2 + $0x90] sm:$0xff] }
  0x1a   :  { %v1320_v26 = vpack.c.bf16 %v53_v24, %v51_v23  ;;  %v55_v29 = vld [vmem:[#allocation2 + $0xa8] sm:$0xff]  ;;  %v57_v30 = vld [vmem:[#allocation2 + $0xb8] sm:$0xff]  ;;  %v1322_v31 = vpack.c.bf16 %v52_v28, %v50_v27  ;;  %v54_v33 = vld [vmem:[#allocation2 + $0xa0] sm:$0xff] }
  0x1b   :  { %1311 = vmatpush1.bf16.msra.mxu0 %v1310_v13  ;;  %v1324_v32 = vpack.c.bf16 %v57_v30, %v55_v29  ;;  %v56_v34 = vld [vmem:[#allocation2 + $0xb0] sm:$0xff]  ;;  %v59_v35 = vld [vmem:[#allocation2 + $0xc8] sm:$0xff]  ;;  %v61_v36 = vld [vmem:[#allocation2 + $0xd8] sm:$0xff] }
  0x1c   :  { %1313 = vmatprep.subr.bf16.mxu0 %v1312_v14  ;;  %v1326_v37 = vpack.c.bf16 %v56_v34, %v54_v33  ;;  %v1328_v38 = vpack.c.bf16 %v61_v36, %v59_v35  ;;  %v58_v39 = vld [vmem:[#allocation2 + $0xc0] sm:$0xff]  ;;  %v60_v40 = vld [vmem:[#allocation2 + $0xd0] sm:$0xff]  ;;  %v27_v41 = vld [vmem:[%s2029_s0 + $0x8] sm:$0xff] }
  0x1d   :  { %v63_v42 = vld [vmem:[#allocation2 + $0xe8] sm:$0xff]  ;;  %v65_v43 = vld [vmem:[#allocation2 + $0xf8] sm:$0xff]  ;;  %356 = vmatprep.mubr.f32.mxu0 %v27_v41  ;;  %v1330_v44 = vpack.c.bf16 %v60_v40, %v58_v39  ;;  %v62_v46 = vld [vmem:[#allocation2 + $0xe0] sm:$0xff] }
  0x1e   :  { %v1332_v45 = vpack.c.bf16 %v65_v43, %v63_v42  ;;  %v64_v47 = vld [vmem:[#allocation2 + $0xf0] sm:$0xff]  ;;  %v67_v48 = vld [vmem:[#allocation2 + $0x108] sm:$0xff]  ;;  %v69_v49 = vld [vmem:[#allocation2 + $0x118] sm:$0xff] }
  0x1f   :  { %1315 = vmatpush1.bf16.msra.mxu0 %v1314_v19  ;;  %v1334_v50 = vpack.c.bf16 %v64_v47, %v62_v46  ;;  %v1336_v51 = vpack.c.bf16 %v69_v49, %v67_v48  ;;  %v66_v52 = vld [vmem:[#allocation2 + $0x100] sm:$0xff]  ;;  %v68_v53 = vld [vmem:[#allocation2 + $0x110] sm:$0xff]  ;;  %v71_v54 = vld [vmem:[#allocation2 + $0x128] sm:$0xff] }
  0x20   :  { %1317 = vmatprep.subr.bf16.mxu0 %v1316_v20  ;;  %v73_v55 = vld [vmem:[#allocation2 + $0x138] sm:$0xff]  ;;  %v1338_v56 = vpack.c.bf16 %v68_v53, %v66_v52  ;;  %v70_v58 = vld [vmem:[#allocation2 + $0x120] sm:$0xff]  ;;  %v72_v59 = vld [vmem:[#allocation2 + $0x130] sm:$0xff] }
  0x21   :  { %v1340_v57 = vpack.c.bf16 %v73_v55, %v71_v54  ;;  %v75_v60 = vld [vmem:[#allocation2 + $0x148] sm:$0xff]  ;;  %v77_v61 = vld [vmem:[#allocation2 + $0x158] sm:$0xff]  ;;  %v1342_v62 = vpack.c.bf16 %v72_v59, %v70_v58  ;;  %v74_v0 = vld [vmem:[#allocation2 + $0x140] sm:$0xff] }
  0x22   :  { %v1344_v63 = vpack.c.bf16 %v77_v61, %v75_v60  ;;  %v76_v1 = vld [vmem:[#allocation2 + $0x150] sm:$0xff]  ;;  %v79_v2 = vld [vmem:[#allocation2 + $0x168] sm:$0xff]  ;;  %v81_v3 = vld [vmem:[#allocation2 + $0x178] sm:$0xff] }
  0x23   :  { %1319 = vmatpush1.bf16.msra.mxu0 %v1318_v25  ;;  %v1346_v4 = vpack.c.bf16 %v76_v1, %v74_v0  ;;  %v1348_v5 = vpack.c.bf16 %v81_v3, %v79_v2  ;;  %v78_v6 = vld [vmem:[#allocation2 + $0x160] sm:$0xff]  ;;  %v80_v7 = vld [vmem:[#allocation2 + $0x170] sm:$0xff]  ;;  %v83_v8 = vld [vmem:[#allocation2 + $0x188] sm:$0xff] }
  0x24   :  { %1321 = vmatprep.subr.bf16.mxu0 %v1320_v26  ;;  %v85_v9 = vld [vmem:[#allocation2 + $0x198] sm:$0xff]  ;;  %v1350_v10 = vpack.c.bf16 %v80_v7, %v78_v6  ;;  %v82_v12 = vld [vmem:[#allocation2 + $0x180] sm:$0xff]  ;;  %v84_v13 = vld [vmem:[#allocation2 + $0x190] sm:$0xff] }
  0x25   :  { %v1352_v11 = vpack.c.bf16 %v85_v9, %v83_v8  ;;  %v87_v14 = vld [vmem:[#allocation2 + $0x1a8] sm:$0xff]  ;;  %v89_v15 = vld [vmem:[#allocation2 + $0x1b8] sm:$0xff]  ;;  %v1354_v16 = vpack.c.bf16 %v84_v13, %v82_v12  ;;  %v86_v18 = vld [vmem:[#allocation2 + $0x1a0] sm:$0xff] }
  0x26   :  { %v1356_v17 = vpack.c.bf16 %v89_v15, %v87_v14  ;;  %v88_v19 = vld [vmem:[#allocation2 + $0x1b0] sm:$0xff]  ;;  %v91_v20 = vld [vmem:[#allocation2 + $0x1c8] sm:$0xff]  ;;  %v93_v21 = vld [vmem:[#allocation2 + $0x1d8] sm:$0xff] }
  0x27   :  { %1323 = vmatpush1.bf16.msra.mxu0 %v1322_v31  ;;  %v1358_v22 = vpack.c.bf16 %v88_v19, %v86_v18  ;;  %v1360_v23 = vpack.c.bf16 %v93_v21, %v91_v20  ;;  %v90_v24 = vld [vmem:[#allocation2 + $0x1c0] sm:$0xff]  ;;  %v92_v25 = vld [vmem:[#allocation2 + $0x1d0] sm:$0xff]  ;;  %v95_v26 = vld [vmem:[#allocation2 + $0x1e8] sm:$0xff] }
  0x28   :  { %1325 = vmatprep.subr.bf16.mxu0 %v1324_v32  ;;  %v97_v27 = vld [vmem:[#allocation2 + $0x1f8] sm:$0xff]  ;;  %v1362_v28 = vpack.c.bf16 %v92_v25, %v90_v24  ;;  %v94_v30 = vld [vmem:[#allocation2 + $0x1e0] sm:$0xff]  ;;  %v96_v31 = vld [vmem:[#allocation2 + $0x1f0] sm:$0xff] }
  0x29   :  { %v1364_v29 = vpack.c.bf16 %v97_v27, %v95_v26  ;;  %v99_v32 = vld [vmem:[#allocation2 + $0x208] sm:$0xff]  ;;  %v101_v33 = vld [vmem:[#allocation2 + $0x218] sm:$0xff]  ;;  %v1366_v34 = vpack.c.bf16 %v96_v31, %v94_v30  ;;  %v98_v36 = vld [vmem:[#allocation2 + $0x200] sm:$0xff] }
  0x2a   :  { %v1368_v35 = vpack.c.bf16 %v101_v33, %v99_v32  ;;  %v105_v39 = vld [vmem:[#allocation2 + $0x238] sm:$0xff]  ;;  %v26_v40 = vld [vmem:[%s2029_s0] sm:$0xff]  ;;  %v107_v46 = vld [vmem:[#allocation2 + $0x248] sm:$0xff] }
  0x2b   :  { %1327 = vmatpush1.bf16.msra.mxu0 %v1326_v37  ;;  %v100_v37 = vld [vmem:[#allocation2 + $0x210] sm:$0xff]  ;;  %v102_v43 = vld [vmem:[#allocation2 + $0x220] sm:$0xff]  ;;  %v109_v47 = vld [vmem:[#allocation2 + $0x258] sm:$0xff] }
  0x2c   :  { %1329 = vmatprep.subr.bf16.mxu0 %v1328_v38  ;;  %v103_v38 = vld [vmem:[#allocation2 + $0x228] sm:$0xff]  ;;  %v1370_v41 = vpack.c.bf16 %v100_v37, %v98_v36  ;;  %v1376_v49 = vpack.c.bf16 %v109_v47, %v107_v46  ;;  %v113_v53 = vld [vmem:[#allocation2 + $0x278] sm:$0xff]  ;;  %v146_v46 = vld [vmem:[#allocation2 + $0x380] sm:$0xff] }
  0x2d   :  { %v1372_v42 = vpack.c.bf16 %v105_v39, %v103_v38  ;;  %v111_v52 = vld [vmem:[#allocation2 + $0x268] sm:$0xff]  ;;  %v117_v59 = vld [vmem:[#allocation2 + $0x298] sm:$0xff]  ;;  %v148_v47 = vld [vmem:[#allocation2 + $0x390] sm:$0xff] }
  0x2e   :  { %v1380_v55 = vpack.c.bf16 %v113_v53, %v111_v52  ;;  %v115_v58 = vld [vmem:[#allocation2 + $0x288] sm:$0xff]  ;;  %v121_v1 = vld [vmem:[#allocation2 + $0x2b8] sm:$0xff]  ;;  %v150_v52 = vld [vmem:[#allocation2 + $0x3a0] sm:$0xff] }
  0x2f   :  { %1331 = vmatpush1.bf16.msra.mxu0 %v1330_v44  ;;  %v104_v44 = vld [vmem:[#allocation2 + $0x230] sm:$0xff]  ;;  %v1384_v61 = vpack.c.bf16 %v117_v59, %v115_v58  ;;  %v119_v0 = vld [vmem:[#allocation2 + $0x2a8] sm:$0xff]  ;;  %v125_v7 = vld [vmem:[#allocation2 + $0x2d8] sm:$0xff] }
  0x30   :  { %1333 = vmatprep.subr.bf16.mxu0 %v1332_v45  ;;  %v29_v45 = vld [vmem:[%s2029_s0 + $0x18] sm:$0xff]  ;;  %v1374_v48 = vpack.c.bf16 %v104_v44, %v102_v43  ;;  %v1388_v3 = vpack.c.bf16 %v121_v1, %v119_v0  ;;  %v123_v6 = vld [vmem:[#allocation2 + $0x2c8] sm:$0xff]  ;;  %v152_v53 = vld [vmem:[#allocation2 + $0x3b0] sm:$0xff] }
  0x31   :  { %v1392_v9 = vpack.c.bf16 %v125_v7, %v123_v6  ;;  %v127_v12 = vld [vmem:[#allocation2 + $0x2e8] sm:$0xff]  ;;  %v129_v13 = vld [vmem:[#allocation2 + $0x2f8] sm:$0xff]  ;;  %v154_v58 = vld [vmem:[#allocation2 + $0x3c0] sm:$0xff] }
  0x32   :  { %v1396_v15 = vpack.c.bf16 %v129_v13, %v127_v12  ;;  %v131_v18 = vld [vmem:[#allocation2 + $0x308] sm:$0xff]  ;;  %v133_v19 = vld [vmem:[#allocation2 + $0x318] sm:$0xff]  ;;  %v156_v59 = vld [vmem:[#allocation2 + $0x3d0] sm:$0xff] }
  0x33   :  { %1335 = vmatpush1.bf16.msra.mxu0 %v1334_v50  ;;  %v106_v50 = vld [vmem:[#allocation2 + $0x240] sm:$0xff]  ;;  %v1400_v21 = vpack.c.bf16 %v133_v19, %v131_v18  ;;  %v135_v24 = vld [vmem:[#allocation2 + $0x328] sm:$0xff]  ;;  %v137_v25 = vld [vmem:[#allocation2 + $0x338] sm:$0xff] }
  0x34   :  { %1337 = vmatprep.subr.bf16.mxu0 %v1336_v51  ;;  %v108_v51 = vld [vmem:[#allocation2 + $0x250] sm:$0xff]  ;;  %v1404_v27 = vpack.c.bf16 %v137_v25, %v135_v24  ;;  %v139_v30 = vld [vmem:[#allocation2 + $0x348] sm:$0xff]  ;;  %v141_v31 = vld [vmem:[#allocation2 + $0x358] sm:$0xff] }
  0x35   :  { %v1378_v54 = vpack.c.bf16 %v108_v51, %v106_v50  ;;  %v1408_v33 = vpack.c.bf16 %v141_v31, %v139_v30  ;;  %v143_v36 = vld [vmem:[#allocation2 + $0x368] sm:$0xff]  ;;  %v145_v37 = vld [vmem:[#allocation2 + $0x378] sm:$0xff]  ;;  %v1418_v50 = vpack.c.bf16 %v148_v47, %v146_v46  ;;  %v158_v0 = vld [vmem:[#allocation2 + $0x3e0] sm:$0xff] }
  0x36   :  { %v1412_v39 = vpack.c.bf16 %v145_v37, %v143_v36  ;;  %v149_v43 = vld [vmem:[#allocation2 + $0x398] sm:$0xff]  ;;  %v160_v1 = vld [vmem:[#allocation2 + $0x3f0] sm:$0xff]  ;;  %v162_v6 = vld [vmem:[#allocation2 + $0x400] sm:$0xff] }
  0x37   :  { %1339 = vmatpush1.bf16.msra.mxu0 %v1338_v56  ;;  %v110_v56 = vld [vmem:[#allocation2 + $0x260] sm:$0xff]  ;;  %v164_v7 = vld [vmem:[#allocation2 + $0x410] sm:$0xff]  ;;  %v589_v36 = vld [vmem:[#allocation2 + $0x8b8] sm:$0xff] }
  0x38   :  { %1341 = vmatprep.subr.bf16.mxu0 %v1340_v57  ;;  %v112_v57 = vld [vmem:[#allocation2 + $0x270] sm:$0xff]  ;;  %v166_v13 = vld [vmem:[#allocation2 + $0x420] sm:$0xff]  ;;  %v593_v46 = vld [vmem:[#allocation2 + $0x8d8] sm:$0xff] }
  0x39   :  { %v1382_v60 = vpack.c.bf16 %v112_v57, %v110_v56  ;;  %v1422_v56 = vpack.c.bf16 %v152_v53, %v150_v52  ;;  %v170_v18 = vld [vmem:[#allocation2 + $0x440] sm:$0xff]  ;;  %v172_v19 = vld [vmem:[#allocation2 + $0x450] sm:$0xff]  ;;  %v179_v47 = vld [vmem:[#allocation2 + $0x488] sm:$0xff] }
  0x3a   :  { %v580_v25 = vld [vmem:[#allocation2 + $0x870] sm:$0xff]  ;;  %v582_v31 = vld [vmem:[#allocation2 + $0x880] sm:$0xff] }
  0x3b   :  { %1343 = vmatpush1.bf16.msra.mxu0 %v1342_v62  ;;  %v114_v62 = vld [vmem:[#allocation2 + $0x280] sm:$0xff] }
  0x3c   :  { %1345 = vmatprep.subr.bf16.mxu0 %v1344_v63  ;;  %v116_v63 = vld [vmem:[#allocation2 + $0x290] sm:$0xff]  ;;  %v590_v53 = vld [vmem:[#allocation2 + $0x8c0] sm:$0xff] }
  0x3d   :  { %v1386_v2 = vpack.c.bf16 %v116_v63, %v114_v62  ;;  %v1426_v62 = vpack.c.bf16 %v156_v59, %v154_v58  ;;  %v597_v58 = vld [vmem:[#allocation2 + $0x8f8] sm:$0xff]  ;;  %v183_v59 = vld [vmem:[#allocation2 + $0x4a8] sm:$0xff] }
  0x3f   :  { %1347 = vmatpush1.bf16.msra.mxu0 %v1346_v4  ;;  %v118_v4 = vld [vmem:[#allocation2 + $0x2a0] sm:$0xff] }
  0x40   :  { %1349 = vmatprep.subr.bf16.mxu0 %v1348_v5  ;;  %v120_v5 = vld [vmem:[#allocation2 + $0x2b0] sm:$0xff] }
  0x41   :  { %v1390_v8 = vpack.c.bf16 %v120_v5, %v118_v4  ;;  %v1430_v4 = vpack.c.bf16 %v160_v1, %v158_v0  ;;  %v594_v1 = vld [vmem:[#allocation2 + $0x8e0] sm:$0xff] }
  0x43   :  { %1351 = vmatpush1.bf16.msra.mxu0 %v1350_v10  ;;  %v122_v10 = vld [vmem:[#allocation2 + $0x2c0] sm:$0xff] }
  0x44   :  { %1353 = vmatprep.subr.bf16.mxu0 %v1352_v11  ;;  %v124_v11 = vld [vmem:[#allocation2 + $0x2d0] sm:$0xff] }
  0x45   :  { %v1394_v14 = vpack.c.bf16 %v124_v11, %v122_v10  ;;  %v28_v10 = vld [vmem:[%s2029_s0 + $0x10] sm:$0xff]  ;;  %v1434_v11 = vpack.c.bf16 %v164_v7, %v162_v6  ;;  %v601_v6 = vld [vmem:[#allocation2 + $0x918] sm:$0xff]  ;;  %v187_v7 = vld [vmem:[#allocation2 + $0x4c8] sm:$0xff] }
  0x47   :  { %1355 = vmatpush1.bf16.msra.mxu0 %v1354_v16  ;;  %v126_v16 = vld [vmem:[#allocation2 + $0x2e0] sm:$0xff] }
  0x48   :  { %1357 = vmatprep.subr.bf16.mxu0 %v1356_v17  ;;  %v128_v17 = vld [vmem:[#allocation2 + $0x2f0] sm:$0xff] }
  0x49   :  { %v1398_v20 = vpack.c.bf16 %v128_v17, %v126_v16  ;;  %v171_v16 = vld [vmem:[#allocation2 + $0x448] sm:$0xff]  ;;  %v173_v17 = vld [vmem:[#allocation2 + $0x458] sm:$0xff] }
  0x4b   :  { %1359 = vmatpush1.bf16.msra.mxu0 %v1358_v22  ;;  %v130_v22 = vld [vmem:[#allocation2 + $0x300] sm:$0xff] }
  0x4c   :  { %1361 = vmatprep.subr.bf16.mxu0 %v1360_v23  ;;  %v132_v23 = vld [vmem:[#allocation2 + $0x310] sm:$0xff] }
  0x4d   :  { %v1402_v26 = vpack.c.bf16 %v132_v23, %v130_v22  ;;  %v578_v22 = vld [vmem:[#allocation2 + $0x860] sm:$0xff] }
  0x4f   :  { %1363 = vmatpush1.bf16.msra.mxu0 %v1362_v28  ;;  %v134_v28 = vld [vmem:[#allocation2 + $0x320] sm:$0xff] }
  0x50   :  { %1365 = vmatprep.subr.bf16.mxu0 %v1364_v29  ;;  %v136_v29 = vld [vmem:[#allocation2 + $0x330] sm:$0xff] }
  0x51   :  { %v1406_v32 = vpack.c.bf16 %v136_v29, %v134_v28  ;;  %v1440_v28 = vpack.c.bf16 %v173_v17, %v171_v16  ;;  %v1562_v29 = vpack.c.bf16 %v580_v25, %v578_v22  ;;  %v188_v16 = vld [vmem:[#allocation2 + $0x4d0] sm:$0xff]  ;;  %v603_v17 = vld [vmem:[#allocation2 + $0x928] sm:$0xff]  ;;  %v602_v25 = vld [vmem:[#allocation2 + $0x920] sm:$0xff] }
  0x53   :  { %1367 = vmatpush1.bf16.msra.mxu0 %v1366_v34  ;;  %v138_v34 = vld [vmem:[#allocation2 + $0x340] sm:$0xff] }
  0x54   :  { %1369 = vmatprep.subr.bf16.mxu0 %v1368_v35  ;;  %v140_v35 = vld [vmem:[#allocation2 + $0x350] sm:$0xff] }
  0x55   :  { %v1410_v38 = vpack.c.bf16 %v140_v35, %v138_v34  ;;  %v175_v34 = vld [vmem:[#allocation2 + $0x468] sm:$0xff]  ;;  %v177_v35 = vld [vmem:[#allocation2 + $0x478] sm:$0xff] }
  0x56   :  { %357 = vmatmul.mubr.f32.vlgmr.msra.gmra.mrb[0].mxu0 %v26_v40  ;;  %v142_v40 = vld [vmem:[#allocation2 + $0x360] sm:$0xff] }
  0x57   :  { %1371 = vmatpush1.bf16.msra.mxu0 %v1370_v41  ;;  %427 = vmatprep.mubr.f32.mxu0 %v29_v45  ;;  %v144_v41 = vld [vmem:[#allocation2 + $0x370] sm:$0xff] }
  0x58   :  { %1373 = vmatprep.subr.bf16.mxu0 %v1372_v42  ;;  %v147_v42 = vld [vmem:[#allocation2 + $0x388] sm:$0xff]  ;;  %v1414_v44 = vpack.c.bf16 %v144_v41, %v142_v40  ;;  %v586_v41 = vld [vmem:[#allocation2 + $0x8a0] sm:$0xff] }
  0x59   :  { %v1416_v45 = vpack.c.bf16 %v149_v43, %v147_v42  ;;  %v588_v42 = vld [vmem:[#allocation2 + $0x8b0] sm:$0xff]  ;;  %v1444_v43 = vpack.c.bf16 %v177_v35, %v175_v34  ;;  %v194_v35 = vld [vmem:[#allocation2 + $0x500] sm:$0xff] }
  0x5b   :  { %1375 = vmatpush1.bf16.msra.mxu0 %v1374_v48  ;;  %v151_v48 = vld [vmem:[#allocation2 + $0x3a8] sm:$0xff] }
  0x5c   :  { %1377 = vmatprep.subr.bf16.mxu0 %v1376_v49  ;;  %v153_v49 = vld [vmem:[#allocation2 + $0x3b8] sm:$0xff] }
  0x5d   :  { %v1420_v51 = vpack.c.bf16 %v153_v49, %v151_v48  ;;  %v181_v48 = vld [vmem:[#allocation2 + $0x498] sm:$0xff]  ;;  %v1570_v49 = vpack.c.bf16 %v588_v42, %v586_v41  ;;  %v611_v41 = vld [vmem:[#allocation2 + $0x968] sm:$0xff] }
  0x5e   :  { %v613_v42 = vld [vmem:[#allocation2 + $0x978] sm:$0xff] }
  0x5f   :  { %1379 = vmatpush1.bf16.msra.mxu0 %v1378_v54  ;;  %v155_v54 = vld [vmem:[#allocation2 + $0x3c8] sm:$0xff] }
  0x60   :  { %1381 = vmatprep.subr.bf16.mxu0 %v1380_v55  ;;  %v157_v55 = vld [vmem:[#allocation2 + $0x3d8] sm:$0xff] }
  0x61   :  { %v1424_v57 = vpack.c.bf16 %v157_v55, %v155_v54  ;;  %v592_v54 = vld [vmem:[#allocation2 + $0x8d0] sm:$0xff]  ;;  %v1448_v55 = vpack.c.bf16 %v181_v48, %v179_v47  ;;  %v198_v47 = vld [vmem:[#allocation2 + $0x520] sm:$0xff]  ;;  %v1592_v48 = vpack.c.bf16 %v613_v42, %v611_v41 }
  0x63   :  { %1383 = vmatpush1.bf16.msra.mxu0 %v1382_v60  ;;  %v159_v60 = vld [vmem:[#allocation2 + $0x3e8] sm:$0xff] }
  0x64   :  { %1385 = vmatprep.subr.bf16.mxu0 %v1384_v61  ;;  %v161_v61 = vld [vmem:[#allocation2 + $0x3f8] sm:$0xff] }
  0x65   :  { %v1428_v63 = vpack.c.bf16 %v161_v61, %v159_v60  ;;  %v185_v60 = vld [vmem:[#allocation2 + $0x4b8] sm:$0xff]  ;;  %v1574_v61 = vpack.c.bf16 %v592_v54, %v590_v53  ;;  %v615_v53 = vld [vmem:[#allocation2 + $0x988] sm:$0xff] }
  0x66   :  { %v617_v54 = vld [vmem:[#allocation2 + $0x998] sm:$0xff] }
  0x67   :  { %1387 = vmatpush1.bf16.msra.mxu0 %v1386_v2  ;;  %v163_v2 = vld [vmem:[#allocation2 + $0x408] sm:$0xff] }
  0x68   :  { %1389 = vmatprep.subr.bf16.mxu0 %v1388_v3  ;;  %v165_v3 = vld [vmem:[#allocation2 + $0x418] sm:$0xff] }
  0x69   :  { %v1432_v5 = vpack.c.bf16 %v165_v3, %v163_v2  ;;  %v596_v2 = vld [vmem:[#allocation2 + $0x8f0] sm:$0xff]  ;;  %v1452_v3 = vpack.c.bf16 %v185_v60, %v183_v59  ;;  %v202_v59 = vld [vmem:[#allocation2 + $0x540] sm:$0xff]  ;;  %v1596_v60 = vpack.c.bf16 %v617_v54, %v615_v53 }
  0x6b   :  { %1391 = vmatpush1.bf16.msra.mxu0 %v1390_v8  ;;  %v167_v8 = vld [vmem:[#allocation2 + $0x428] sm:$0xff] }
  0x6c   :  { %1393 = vmatprep.subr.bf16.mxu0 %v1392_v9  ;;  %v169_v9 = vld [vmem:[#allocation2 + $0x438] sm:$0xff] }
  0x6d   :  { %v1436_v12 = vpack.c.bf16 %v169_v9, %v167_v8  ;;  %v189_v8 = vld [vmem:[#allocation2 + $0x4d8] sm:$0xff]  ;;  %v1578_v9 = vpack.c.bf16 %v596_v2, %v594_v1  ;;  %v619_v1 = vld [vmem:[#allocation2 + $0x9a8] sm:$0xff] }
  0x6e   :  { %v621_v2 = vld [vmem:[#allocation2 + $0x9b8] sm:$0xff] }
  0x6f   :  { %1395 = vmatpush1.bf16.msra.mxu0 %v1394_v14  ;;  %v168_v14 = vld [vmem:[#allocation2 + $0x430] sm:$0xff] }
  0x70   :  { %1397 = vmatprep.subr.bf16.mxu0 %v1396_v15  ;;  %v31_v15 = vld [vmem:[%s2029_s0 + $0x28] sm:$0xff]  ;;  %v1438_v23 = vpack.c.bf16 %v168_v14, %v166_v13  ;;  %v598_v13 = vld [vmem:[#allocation2 + $0x900] sm:$0xff]  ;;  %v600_v14 = vld [vmem:[#allocation2 + $0x910] sm:$0xff] }
  0x73   :  { %1399 = vmatpush1.bf16.msra.mxu0 %v1398_v20  ;;  %v579_v20 = vld [vmem:[#allocation2 + $0x868] sm:$0xff] }
  0x74   :  { %1401 = vmatprep.subr.bf16.mxu0 %v1400_v21  ;;  %v581_v21 = vld [vmem:[#allocation2 + $0x878] sm:$0xff] }
  0x75   :  { %v1560_v24 = vpack.c.bf16 %v581_v21, %v579_v20  ;;  %v193_v20 = vld [vmem:[#allocation2 + $0x4f8] sm:$0xff]  ;;  %v1582_v21 = vpack.c.bf16 %v600_v14, %v598_v13  ;;  %v623_v13 = vld [vmem:[#allocation2 + $0x9c8] sm:$0xff] }
  0x76   :  { %v625_v14 = vld [vmem:[#allocation2 + $0x9d8] sm:$0xff] }
  0x77   :  { %1403 = vmatpush1.bf16.msra.mxu0 %v1402_v26  ;;  %v583_v26 = vld [vmem:[#allocation2 + $0x888] sm:$0xff]  ;;  %1561 = vmatprep.subr.bf16.mxu1 %v1560_v24 }
  0x78   :  { %1405 = vmatprep.subr.bf16.mxu0 %v1404_v27  ;;  %v585_v27 = vld [vmem:[#allocation2 + $0x898] sm:$0xff]  ;;  %1563 = vmatpush1.bf16.msra.mxu1 %v1562_v29  ;;  %v607_v29 = vld [vmem:[#allocation2 + $0x948] sm:$0xff] }
  0x79   :  { %v1564_v30 = vpack.c.bf16 %v585_v27, %v583_v26  ;;  %v604_v26 = vld [vmem:[#allocation2 + $0x930] sm:$0xff] }
  0x7b   :  { %1407 = vmatpush1.bf16.msra.mxu0 %v1406_v32  ;;  %v584_v32 = vld [vmem:[#allocation2 + $0x890] sm:$0xff]  ;;  %1565 = vmatprep.subr.bf16.mxu1 %v1564_v30  ;;  %v609_v30 = vld [vmem:[#allocation2 + $0x958] sm:$0xff] }
  0x7c   :  { %1409 = vmatprep.subr.bf16.mxu0 %v1408_v33  ;;  %v587_v33 = vld [vmem:[#allocation2 + $0x8a8] sm:$0xff]  ;;  %v1566_v37 = vpack.c.bf16 %v584_v32, %v582_v31  ;;  %v197_v32 = vld [vmem:[#allocation2 + $0x518] sm:$0xff] }
  0x7d   :  { %v1568_v40 = vpack.c.bf16 %v589_v36, %v587_v33  ;;  %v195_v31 = vld [vmem:[#allocation2 + $0x508] sm:$0xff]  ;;  %v1586_v33 = vpack.c.bf16 %v604_v26, %v602_v25  ;;  %v1588_v36 = vpack.c.bf16 %v609_v30, %v607_v29  ;;  %v629_v26 = vld [vmem:[#allocation2 + $0x9f8] sm:$0xff] }
  0x7e   :  { %1567 = vmatpush1.bf16.msra.mxu1 %v1566_v37  ;;  %v606_v37 = vld [vmem:[#allocation2 + $0x940] sm:$0xff]  ;;  %v627_v25 = vld [vmem:[#allocation2 + $0x9e8] sm:$0xff] }
  0x7f   :  { %1411 = vmatpush1.bf16.msra.mxu0 %v1410_v38  ;;  %v1442_v38 = vpack.c.bf16 %v172_v19, %v170_v18  ;;  %1569 = vmatprep.subr.bf16.mxu1 %v1568_v40  ;;  %v605_v18 = vld [vmem:[#allocation2 + $0x938] sm:$0xff]  ;;  %v191_v19 = vld [vmem:[#allocation2 + $0x4e8] sm:$0xff]  ;;  %v196_v40 = vld [vmem:[#allocation2 + $0x510] sm:$0xff] }
  0x80   :  { %1413 = vmatprep.subr.bf16.mxu0 %v1412_v39  ;;  %v174_v39 = vld [vmem:[#allocation2 + $0x460] sm:$0xff]  ;;  %v1584_v24 = vpack.c.bf16 %v605_v18, %v603_v17  ;;  %v1460_v27 = vpack.c.bf16 %v193_v20, %v191_v19  ;;  %v1604_v20 = vpack.c.bf16 %v625_v14, %v623_v13  ;;  %v236_v14 = vld [vmem:[#allocation2 + $0x650] sm:$0xff] }
  0x81   :  { %v210_v19 = vld [vmem:[#allocation2 + $0x580] sm:$0xff] }
  0x82   :  { %1571 = vmatpush1.bf16.msra.mxu1 %v1570_v49  ;;  %v610_v49 = vld [vmem:[#allocation2 + $0x960] sm:$0xff] }
  0x83   :  { %1415 = vmatpush1.bf16.msra.mxu0 %v1414_v44  ;;  %v176_v44 = vld [vmem:[#allocation2 + $0x470] sm:$0xff]  ;;  %v234_v13 = vld [vmem:[#allocation2 + $0x640] sm:$0xff] }
  0x84   :  { %1417 = vmatprep.subr.bf16.mxu0 %v1416_v45  ;;  %v591_v45 = vld [vmem:[#allocation2 + $0x8c8] sm:$0xff] }
  0x85   :  { %v1572_v52 = vpack.c.bf16 %v593_v46, %v591_v45  ;;  %v1466_v46 = vpack.c.bf16 %v196_v40, %v194_v35  ;;  %v221_v40 = vld [vmem:[#allocation2 + $0x5d8] sm:$0xff] }
  0x87   :  { %1419 = vmatpush1.bf16.msra.mxu0 %v1418_v50  ;;  %v1446_v50 = vpack.c.bf16 %v176_v44, %v174_v39  ;;  %1573 = vmatprep.subr.bf16.mxu1 %v1572_v52  ;;  %v1464_v39 = vpack.c.bf16 %v197_v32, %v195_v31  ;;  %v201_v44 = vld [vmem:[#allocation2 + $0x538] sm:$0xff]  ;;  %v200_v52 = vld [vmem:[#allocation2 + $0x530] sm:$0xff]  ;;  %v214_v31 = vld [vmem:[#allocation2 + $0x5a0] sm:$0xff]  ;;  %v1608_v32 = vpack.c.bf16 %v629_v26, %v627_v25 }
  0x88   :  { %1421 = vmatprep.subr.bf16.mxu0 %v1420_v51  ;;  %v178_v51 = vld [vmem:[#allocation2 + $0x480] sm:$0xff]  ;;  %1575 = vmatpush1.bf16.msra.mxu1 %v1574_v61  ;;  %v244_v26 = vld [vmem:[#allocation2 + $0x690] sm:$0xff] }
  0x89   :  { %v614_v61 = vld [vmem:[#allocation2 + $0x980] sm:$0xff] }
  0x8a   :  { %v242_v25 = vld [vmem:[#allocation2 + $0x680] sm:$0xff] }
  0x8b   :  { %1423 = vmatpush1.bf16.msra.mxu0 %v1422_v56  ;;  %v180_v56 = vld [vmem:[#allocation2 + $0x490] sm:$0xff] }
  0x8c   :  { %1425 = vmatprep.subr.bf16.mxu0 %v1424_v57  ;;  %v595_v57 = vld [vmem:[#allocation2 + $0x8e8] sm:$0xff] }
  0x8d   :  { %v1576_v0 = vpack.c.bf16 %v597_v58, %v595_v57  ;;  %v1470_v58 = vpack.c.bf16 %v200_v52, %v198_v47  ;;  %v225_v52 = vld [vmem:[#allocation2 + $0x5f8] sm:$0xff] }
  0x8f   :  { %1427 = vmatpush1.bf16.msra.mxu0 %v1426_v62  ;;  %v1450_v62 = vpack.c.bf16 %v180_v56, %v178_v51  ;;  %1577 = vmatprep.subr.bf16.mxu1 %v1576_v0  ;;  %v205_v56 = vld [vmem:[#allocation2 + $0x558] sm:$0xff]  ;;  %v204_v0 = vld [vmem:[#allocation2 + $0x550] sm:$0xff] }
  0x90   :  { %1429 = vmatprep.subr.bf16.mxu0 %v1428_v63  ;;  %v182_v63 = vld [vmem:[#allocation2 + $0x4a0] sm:$0xff]  ;;  %1579 = vmatpush1.bf16.msra.mxu1 %v1578_v9 }
  0x91   :  { %v618_v9 = vld [vmem:[#allocation2 + $0x9a0] sm:$0xff] }
  0x93   :  { %1431 = vmatpush1.bf16.msra.mxu0 %v1430_v4  ;;  %v184_v4 = vld [vmem:[#allocation2 + $0x4b0] sm:$0xff] }
  0x94   :  { %1433 = vmatprep.subr.bf16.mxu0 %v1432_v5  ;;  %v599_v5 = vld [vmem:[#allocation2 + $0x908] sm:$0xff] }
  0x96   :  { %428 = vmatmul.mubr.f32.vlgmr.msra.gmra.mrb[0].mxu0 %v28_v10  ;;  %v1454_v10 = vpack.c.bf16 %v184_v4, %v182_v63  ;;  %v209_v4 = vld [vmem:[#allocation2 + $0x578] sm:$0xff] }
  0x97   :  { %1435 = vmatpush1.bf16.msra.mxu0 %v1434_v11  ;;  %498 = vmatprep.mubr.f32.mxu0 %v31_v15  ;;  %v186_v11 = vld [vmem:[#allocation2 + $0x4c0] sm:$0xff]  ;;  %v1456_v15 = vpack.c.bf16 %v189_v8, %v187_v7  ;;  %v1600_v8 = vpack.c.bf16 %v621_v2, %v619_v1  ;;  %v231_v1 = vld [vmem:[#allocation2 + $0x628] sm:$0xff]  ;;  %v233_v2 = vld [vmem:[#allocation2 + $0x638] sm:$0xff] }
  0x98   :  { %1437 = vmatprep.subr.bf16.mxu0 %v1436_v12  ;;  %v1580_v12 = vpack.c.bf16 %v601_v6, %v599_v5  ;;  %v1458_v22 = vpack.c.bf16 %v188_v16, %v186_v11  ;;  %v1474_v6 = vpack.c.bf16 %v204_v0, %v202_v59  ;;  %v206_v7 = vld [vmem:[#allocation2 + $0x560] sm:$0xff]  ;;  %v213_v16 = vld [vmem:[#allocation2 + $0x598] sm:$0xff]  ;;  %v227_v59 = vld [vmem:[#allocation2 + $0x608] sm:$0xff] }
  0x99   :  { %v228_v0 = vld [vmem:[#allocation2 + $0x610] sm:$0xff] }
  0x9a   :  { %1581 = vmatprep.subr.bf16.mxu1 %v1580_v12  ;;  %v208_v12 = vld [vmem:[#allocation2 + $0x570] sm:$0xff] }
  0x9b   :  { %1439 = vmatpush1.bf16.msra.mxu0 %v1438_v23  ;;  %v190_v23 = vld [vmem:[#allocation2 + $0x4e0] sm:$0xff]  ;;  %1583 = vmatpush1.bf16.msra.mxu1 %v1582_v21  ;;  %v1478_v18 = vpack.c.bf16 %v208_v12, %v206_v7  ;;  %v232_v7 = vld [vmem:[#allocation2 + $0x630] sm:$0xff] }
  0x9c   :  { %1441 = vmatprep.subr.bf16.mxu0 %v1440_v28  ;;  %v192_v28 = vld [vmem:[#allocation2 + $0x4f0] sm:$0xff]  ;;  %1585 = vmatprep.subr.bf16.mxu1 %v1584_v24  ;;  %v622_v21 = vld [vmem:[#allocation2 + $0x9c0] sm:$0xff] }
  0x9d   :  { %v1462_v34 = vpack.c.bf16 %v192_v28, %v190_v23  ;;  %v212_v24 = vld [vmem:[#allocation2 + $0x590] sm:$0xff]  ;;  %v217_v28 = vld [vmem:[#allocation2 + $0x5b8] sm:$0xff] }
  0x9e   :  { %v1482_v30 = vpack.c.bf16 %v212_v24, %v210_v19  ;;  %v238_v19 = vld [vmem:[#allocation2 + $0x660] sm:$0xff] }
  0x9f   :  { %1443 = vmatpush1.bf16.msra.mxu0 %v1442_v38  ;;  %v608_v38 = vld [vmem:[#allocation2 + $0x950] sm:$0xff]  ;;  %1587 = vmatpush1.bf16.msra.mxu1 %v1586_v33  ;;  %v626_v33 = vld [vmem:[#allocation2 + $0x9e0] sm:$0xff] }
  0xa0   :  { %1445 = vmatprep.subr.bf16.mxu0 %v1444_v43  ;;  %v199_v43 = vld [vmem:[#allocation2 + $0x528] sm:$0xff]  ;;  %v1590_v45 = vpack.c.bf16 %v608_v38, %v606_v37  ;;  %1589 = vmatprep.subr.bf16.mxu1 %v1588_v36  ;;  %v216_v36 = vld [vmem:[#allocation2 + $0x5b0] sm:$0xff]  ;;  %v633_v38 = vld [vmem:[#allocation2 + $0xa18] sm:$0xff] }
  0xa1   :  { %v1468_v51 = vpack.c.bf16 %v201_v44, %v199_v43  ;;  %v631_v37 = vld [vmem:[#allocation2 + $0xa08] sm:$0xff]  ;;  %v1486_v42 = vpack.c.bf16 %v216_v36, %v214_v31  ;;  %v218_v43 = vld [vmem:[#allocation2 + $0x5c0] sm:$0xff] }
  0xa2   :  { %v1612_v44 = vpack.c.bf16 %v633_v38, %v631_v37  ;;  %v246_v31 = vld [vmem:[#allocation2 + $0x6a0] sm:$0xff]  ;;  %v252_v38 = vld [vmem:[#allocation2 + $0x6d0] sm:$0xff] }
  0xa3   :  { %1447 = vmatpush1.bf16.msra.mxu0 %v1446_v50  ;;  %v612_v50 = vld [vmem:[#allocation2 + $0x970] sm:$0xff]  ;;  %1591 = vmatpush1.bf16.msra.mxu1 %v1590_v45  ;;  %v630_v45 = vld [vmem:[#allocation2 + $0xa00] sm:$0xff] }
  0xa4   :  { %1449 = vmatprep.subr.bf16.mxu0 %v1448_v55  ;;  %v203_v55 = vld [vmem:[#allocation2 + $0x548] sm:$0xff]  ;;  %v1594_v57 = vpack.c.bf16 %v612_v50, %v610_v49  ;;  %1593 = vmatprep.subr.bf16.mxu1 %v1592_v48  ;;  %v220_v48 = vld [vmem:[#allocation2 + $0x5d0] sm:$0xff]  ;;  %v637_v50 = vld [vmem:[#allocation2 + $0xa38] sm:$0xff] }
  0xa5   :  { %v1472_v63 = vpack.c.bf16 %v205_v56, %v203_v55  ;;  %v635_v49 = vld [vmem:[#allocation2 + $0xa28] sm:$0xff]  ;;  %v1490_v54 = vpack.c.bf16 %v220_v48, %v218_v43  ;;  %v250_v37 = vld [vmem:[#allocation2 + $0x6c0] sm:$0xff] }
  0xa6   :  { %v1616_v55 = vpack.c.bf16 %v637_v50, %v635_v49  ;;  %v254_v43 = vld [vmem:[#allocation2 + $0x6e0] sm:$0xff]  ;;  %v260_v50 = vld [vmem:[#allocation2 + $0x710] sm:$0xff] }
  0xa7   :  { %1451 = vmatpush1.bf16.msra.mxu0 %v1450_v62  ;;  %v616_v62 = vld [vmem:[#allocation2 + $0x990] sm:$0xff]  ;;  %1595 = vmatpush1.bf16.msra.mxu1 %v1594_v57  ;;  %v222_v57 = vld [vmem:[#allocation2 + $0x5e0] sm:$0xff] }
  0xa8   :  { %1453 = vmatprep.subr.bf16.mxu0 %v1452_v3  ;;  %v207_v3 = vld [vmem:[#allocation2 + $0x568] sm:$0xff]  ;;  %v1598_v5 = vpack.c.bf16 %v616_v62, %v614_v61  ;;  %1597 = vmatprep.subr.bf16.mxu1 %v1596_v60  ;;  %v229_v60 = vld [vmem:[#allocation2 + $0x618] sm:$0xff]  ;;  %v258_v49 = vld [vmem:[#allocation2 + $0x700] sm:$0xff] }
  0xa9   :  { %v1476_v11 = vpack.c.bf16 %v209_v4, %v207_v3  ;;  %v1496_v62 = vpack.c.bf16 %v229_v60, %v227_v59  ;;  %v30_v3 = vld [vmem:[%s2029_s0 + $0x20] sm:$0xff] }
  0xab   :  { %1455 = vmatpush1.bf16.msra.mxu0 %v1454_v10  ;;  %v620_v10 = vld [vmem:[#allocation2 + $0x9b0] sm:$0xff]  ;;  %1599 = vmatpush1.bf16.msra.mxu1 %v1598_v5  ;;  %v1500_v5 = vpack.c.bf16 %v233_v2, %v231_v1 }
  0xac   :  { %1457 = vmatprep.subr.bf16.mxu0 %v1456_v15  ;;  %v211_v15 = vld [vmem:[#allocation2 + $0x588] sm:$0xff]  ;;  %v1602_v17 = vpack.c.bf16 %v620_v10, %v618_v9  ;;  %1601 = vmatprep.subr.bf16.mxu1 %v1600_v8  ;;  %v33_v8 = vld [vmem:[%s2029_s0 + $0x38] sm:$0xff] }
  0xad   :  { %v1480_v23 = vpack.c.bf16 %v213_v16, %v211_v15  ;;  %v235_v9 = vld [vmem:[#allocation2 + $0x648] sm:$0xff]  ;;  %v237_v10 = vld [vmem:[#allocation2 + $0x658] sm:$0xff] }
  0xae   :  { %v1504_v12 = vpack.c.bf16 %v237_v10, %v235_v9  ;;  %v239_v15 = vld [vmem:[#allocation2 + $0x668] sm:$0xff]  ;;  %v241_v16 = vld [vmem:[#allocation2 + $0x678] sm:$0xff]  ;;  %v274_v9 = vld [vmem:[#allocation2 + $0x780] sm:$0xff] }
  0xaf   :  { %1459 = vmatpush1.bf16.msra.mxu0 %v1458_v22  ;;  %v624_v22 = vld [vmem:[#allocation2 + $0x9d0] sm:$0xff]  ;;  %1603 = vmatpush1.bf16.msra.mxu1 %v1602_v17  ;;  %v1506_v17 = vpack.c.bf16 %v236_v14, %v234_v13 }
  0xb0   :  { %1461 = vmatprep.subr.bf16.mxu0 %v1460_v27  ;;  %v215_v27 = vld [vmem:[#allocation2 + $0x5a8] sm:$0xff]  ;;  %v1606_v29 = vpack.c.bf16 %v624_v22, %v622_v21  ;;  %1605 = vmatprep.subr.bf16.mxu1 %v1604_v20  ;;  %v240_v20 = vld [vmem:[#allocation2 + $0x670] sm:$0xff]  ;;  %v245_v22 = vld [vmem:[#allocation2 + $0x698] sm:$0xff] }
  0xb1   :  { %v1484_v35 = vpack.c.bf16 %v217_v28, %v215_v27  ;;  %v243_v21 = vld [vmem:[#allocation2 + $0x688] sm:$0xff]  ;;  %v249_v28 = vld [vmem:[#allocation2 + $0x6b8] sm:$0xff]  ;;  %v276_v10 = vld [vmem:[#allocation2 + $0x790] sm:$0xff] }
  0xb2   :  { %v1512_v24 = vpack.c.bf16 %v245_v22, %v243_v21  ;;  %v247_v27 = vld [vmem:[#allocation2 + $0x6a8] sm:$0xff]  ;;  %v1546_v13 = vpack.c.bf16 %v276_v10, %v274_v9  ;;  %v282_v21 = vld [vmem:[#allocation2 + $0x7c0] sm:$0xff]  ;;  %v284_v22 = vld [vmem:[#allocation2 + $0x7d0] sm:$0xff] }
  0xb3   :  { %1463 = vmatpush1.bf16.msra.mxu0 %v1462_v34  ;;  %v628_v34 = vld [vmem:[#allocation2 + $0x9f0] sm:$0xff]  ;;  %1607 = vmatpush1.bf16.msra.mxu1 %v1606_v29  ;;  %v1514_v29 = vpack.c.bf16 %v244_v26, %v242_v25  ;;  %v1554_v25 = vpack.c.bf16 %v284_v22, %v282_v21 }
  0xb4   :  { %1465 = vmatprep.subr.bf16.mxu0 %v1464_v39  ;;  %v219_v39 = vld [vmem:[#allocation2 + $0x5c8] sm:$0xff]  ;;  %v1610_v41 = vpack.c.bf16 %v628_v34, %v626_v33  ;;  %1609 = vmatprep.subr.bf16.mxu1 %v1608_v32  ;;  %v248_v32 = vld [vmem:[#allocation2 + $0x6b0] sm:$0xff]  ;;  %v253_v34 = vld [vmem:[#allocation2 + $0x6d8] sm:$0xff] }
  0xb5   :  { %v1488_v47 = vpack.c.bf16 %v221_v40, %v219_v39  ;;  %v251_v33 = vld [vmem:[#allocation2 + $0x6c8] sm:$0xff]  ;;  %v257_v40 = vld [vmem:[#allocation2 + $0x6f8] sm:$0xff] }
  0xb6   :  { %v1520_v36 = vpack.c.bf16 %v253_v34, %v251_v33  ;;  %v255_v39 = vld [vmem:[#allocation2 + $0x6e8] sm:$0xff] }
  0xb7   :  { %1467 = vmatpush1.bf16.msra.mxu0 %v1466_v46  ;;  %v632_v46 = vld [vmem:[#allocation2 + $0xa10] sm:$0xff]  ;;  %1611 = vmatpush1.bf16.msra.mxu1 %v1610_v41  ;;  %v1522_v41 = vpack.c.bf16 %v252_v38, %v250_v37  ;;  %v639_v34 = vld [vmem:[#allocation2 + $0xa48] sm:$0xff]  ;;  %v638_v37 = vld [vmem:[#allocation2 + $0xa40] sm:$0xff] }
  0xb8   :  { %1469 = vmatprep.subr.bf16.mxu0 %v1468_v51  ;;  %v223_v51 = vld [vmem:[#allocation2 + $0x5e8] sm:$0xff]  ;;  %v1614_v53 = vpack.c.bf16 %v632_v46, %v630_v45  ;;  %1613 = vmatprep.subr.bf16.mxu1 %v1612_v44  ;;  %v256_v44 = vld [vmem:[#allocation2 + $0x6f0] sm:$0xff]  ;;  %v261_v46 = vld [vmem:[#allocation2 + $0x718] sm:$0xff] }
  0xb9   :  { %v1492_v56 = vpack.c.bf16 %v225_v52, %v223_v51  ;;  %v259_v45 = vld [vmem:[#allocation2 + $0x708] sm:$0xff]  ;;  %v265_v52 = vld [vmem:[#allocation2 + $0x738] sm:$0xff]  ;;  %v640_v38 = vld [vmem:[#allocation2 + $0xa50] sm:$0xff] }
  0xba   :  { %v1528_v48 = vpack.c.bf16 %v261_v46, %v259_v45  ;;  %v263_v51 = vld [vmem:[#allocation2 + $0x728] sm:$0xff] }
  0xbb   :  { %1471 = vmatpush1.bf16.msra.mxu0 %v1470_v58  ;;  %v224_v58 = vld [vmem:[#allocation2 + $0x5f0] sm:$0xff]  ;;  %1615 = vmatpush1.bf16.msra.mxu1 %v1614_v53  ;;  %v1530_v53 = vpack.c.bf16 %v260_v50, %v258_v49 }
  0xbc   :  { %1473 = vmatprep.subr.bf16.mxu0 %v1472_v63  ;;  %v1494_v61 = vpack.c.bf16 %v224_v58, %v222_v57  ;;  %1617 = vmatprep.subr.bf16.mxu1 %v1616_v55  ;;  %v226_v63 = vld [vmem:[#allocation2 + $0x600] sm:$0xff]  ;;  %v267_v57 = vld [vmem:[#allocation2 + $0x748] sm:$0xff]  ;;  %v269_v58 = vld [vmem:[#allocation2 + $0x758] sm:$0xff] }
  0xbd   :  { %v1498_v4 = vpack.c.bf16 %v228_v0, %v226_v63  ;;  %v262_v55 = vld [vmem:[#allocation2 + $0x720] sm:$0xff]  ;;  %v1536_v60 = vpack.c.bf16 %v269_v58, %v267_v57  ;;  %v271_v63 = vld [vmem:[#allocation2 + $0x768] sm:$0xff]  ;;  %v273_v0 = vld [vmem:[#allocation2 + $0x778] sm:$0xff] }
  0xbe   :  { %v1540_v2 = vpack.c.bf16 %v273_v0, %v271_v63  ;;  %v719_v49 = vld [vmem:[#allocation2 + $0xa70] sm:$0xff]  ;;  %v721_v57 = vld [vmem:[#allocation2 + $0xa80] sm:$0xff] }
  0xbf   :  { %1475 = vmatpush1.bf16.msra.mxu0 %v1474_v6  ;;  %v230_v6 = vld [vmem:[#allocation2 + $0x620] sm:$0xff]  ;;  %v723_v58 = vld [vmem:[#allocation2 + $0xa90] sm:$0xff] }
  0xc0   :  { %1477 = vmatprep.subr.bf16.mxu0 %v1476_v11  ;;  %v1502_v11 = vpack.c.bf16 %v232_v7, %v230_v6  ;;  %v277_v6 = vld [vmem:[#allocation2 + $0x798] sm:$0xff]  ;;  %v725_v63 = vld [vmem:[#allocation2 + $0xaa0] sm:$0xff]  ;;  %v727_v0 = vld [vmem:[#allocation2 + $0xab0] sm:$0xff] }
  0xc3   :  { %1479 = vmatpush1.bf16.msra.mxu0 %v1478_v18  ;;  %v1508_v18 = vpack.c.bf16 %v241_v16, %v239_v15  ;;  %v278_v15 = vld [vmem:[#allocation2 + $0x7a0] sm:$0xff]  ;;  %v280_v16 = vld [vmem:[#allocation2 + $0x7b0] sm:$0xff] }
  0xc4   :  { %1481 = vmatprep.subr.bf16.mxu0 %v1480_v23  ;;  %v1510_v23 = vpack.c.bf16 %v240_v20, %v238_v19  ;;  %v1550_v19 = vpack.c.bf16 %v280_v16, %v278_v15 }
  0xc7   :  { %1483 = vmatpush1.bf16.msra.mxu0 %v1482_v30  ;;  %v1516_v30 = vpack.c.bf16 %v249_v28, %v247_v27  ;;  %v286_v27 = vld [vmem:[#allocation2 + $0x7e0] sm:$0xff]  ;;  %v288_v28 = vld [vmem:[#allocation2 + $0x7f0] sm:$0xff] }
  0xc8   :  { %1485 = vmatprep.subr.bf16.mxu0 %v1484_v35  ;;  %v1518_v35 = vpack.c.bf16 %v248_v32, %v246_v31  ;;  %v634_v31 = vld [vmem:[#allocation2 + $0xa20] sm:$0xff]  ;;  %v636_v32 = vld [vmem:[#allocation2 + $0xa30] sm:$0xff] }
  0xc9   :  { %v1618_v33 = vpack.c.bf16 %v636_v32, %v634_v31  ;;  %v750_v31 = vld [vmem:[#allocation2 + $0xb68] sm:$0xff]  ;;  %v752_v32 = vld [vmem:[#allocation2 + $0xb78] sm:$0xff] }
  0xcb   :  { %1487 = vmatpush1.bf16.msra.mxu0 %v1486_v42  ;;  %v1524_v42 = vpack.c.bf16 %v257_v40, %v255_v39  ;;  %1619 = vmatpush1.bf16.msra.mxu1 %v1618_v33  ;;  %v1622_v39 = vpack.c.bf16 %v640_v38, %v638_v37  ;;  %v718_v40 = vld [vmem:[#allocation2 + $0xa68] sm:$0xff]  ;;  %v756_v38 = vld [vmem:[#allocation2 + $0xb98] sm:$0xff] }
  0xcc   :  { %1489 = vmatprep.subr.bf16.mxu0 %v1488_v47  ;;  %v1526_v47 = vpack.c.bf16 %v256_v44, %v254_v43  ;;  %v290_v43 = vld [vmem:[#allocation2 + $0x800] sm:$0xff]  ;;  %v291_v44 = vld [vmem:[#allocation2 + $0x808] sm:$0xff] }
  0xcd   :  { %v754_v37 = vld [vmem:[#allocation2 + $0xb88] sm:$0xff] }
  0xcf   :  { %1491 = vmatpush1.bf16.msra.mxu0 %v1490_v54  ;;  %v1532_v54 = vpack.c.bf16 %v265_v52, %v263_v51  ;;  %v722_v51 = vld [vmem:[#allocation2 + $0xa88] sm:$0xff]  ;;  %v724_v52 = vld [vmem:[#allocation2 + $0xa98] sm:$0xff] }
  0xd0   :  { %1493 = vmatprep.subr.bf16.mxu0 %v1492_v56  ;;  %v264_v56 = vld [vmem:[#allocation2 + $0x730] sm:$0xff] }
  0xd1   :  { %v1534_v59 = vpack.c.bf16 %v264_v56, %v262_v55  ;;  %v1628_v56 = vpack.c.bf16 %v724_v52, %v722_v51  ;;  %v762_v51 = vld [vmem:[#allocation2 + $0xbc8] sm:$0xff]  ;;  %v764_v52 = vld [vmem:[#allocation2 + $0xbd8] sm:$0xff] }
  0xd3   :  { %1495 = vmatpush1.bf16.msra.mxu0 %v1494_v61  ;;  %v266_v61 = vld [vmem:[#allocation2 + $0x740] sm:$0xff] }
  0xd4   :  { %1497 = vmatprep.subr.bf16.mxu0 %v1496_v62  ;;  %v268_v62 = vld [vmem:[#allocation2 + $0x750] sm:$0xff] }
  0xd5   :  { %v1538_v1 = vpack.c.bf16 %v268_v62, %v266_v61  ;;  %v1630_v61 = vpack.c.bf16 %v723_v58, %v721_v57  ;;  %v761_v57 = vld [vmem:[#allocation2 + $0xbc0] sm:$0xff]  ;;  %v763_v58 = vld [vmem:[#allocation2 + $0xbd0] sm:$0xff] }
  0xd6   :  { %499 = vmatmul.mubr.f32.vlgmr.msra.gmra.mrb[0].mxu0 %v30_v3  ;;  %v270_v3 = vld [vmem:[#allocation2 + $0x760] sm:$0xff] }
  0xd7   :  { %1499 = vmatpush1.bf16.msra.mxu0 %v1498_v4  ;;  %569 = vmatprep.mubr.f32.mxu0 %v33_v8  ;;  %v272_v4 = vld [vmem:[#allocation2 + $0x770] sm:$0xff] }
  0xd8   :  { %1501 = vmatprep.subr.bf16.mxu0 %v1500_v5  ;;  %v275_v5 = vld [vmem:[#allocation2 + $0x788] sm:$0xff]  ;;  %v1542_v7 = vpack.c.bf16 %v272_v4, %v270_v3  ;;  %v1634_v3 = vpack.c.bf16 %v727_v0, %v725_v63  ;;  %v765_v63 = vld [vmem:[#allocation2 + $0xbe0] sm:$0xff]  ;;  %v767_v0 = vld [vmem:[#allocation2 + $0xbf0] sm:$0xff] }
  0xd9   :  { %v1544_v8 = vpack.c.bf16 %v277_v6, %v275_v5  ;;  %v729_v5 = vld [vmem:[#allocation2 + $0xac0] sm:$0xff]  ;;  %v731_v6 = vld [vmem:[#allocation2 + $0xad0] sm:$0xff] }
  0xda   :  { %v1638_v9 = vpack.c.bf16 %v731_v6, %v729_v5  ;;  %v769_v5 = vld [vmem:[#allocation2 + $0xc00] sm:$0xff]  ;;  %v771_v6 = vld [vmem:[#allocation2 + $0xc10] sm:$0xff] }
  0xdb   :  { %1503 = vmatpush1.bf16.msra.mxu0 %v1502_v11  ;;  %v279_v11 = vld [vmem:[#allocation2 + $0x7a8] sm:$0xff] }
  0xdc   :  { %1505 = vmatprep.subr.bf16.mxu0 %v1504_v12  ;;  %v281_v12 = vld [vmem:[#allocation2 + $0x7b8] sm:$0xff] }
  0xdd   :  { %v1548_v14 = vpack.c.bf16 %v281_v12, %v279_v11  ;;  %v733_v11 = vld [vmem:[#allocation2 + $0xae0] sm:$0xff]  ;;  %v735_v12 = vld [vmem:[#allocation2 + $0xaf0] sm:$0xff] }
  0xde   :  { %v1642_v15 = vpack.c.bf16 %v735_v12, %v733_v11  ;;  %v773_v11 = vld [vmem:[#allocation2 + $0xc20] sm:$0xff]  ;;  %v775_v12 = vld [vmem:[#allocation2 + $0xc30] sm:$0xff] }
  0xdf   :  { %1507 = vmatpush1.bf16.msra.mxu0 %v1506_v17  ;;  %v283_v17 = vld [vmem:[#allocation2 + $0x7c8] sm:$0xff] }
  0xe0   :  { %1509 = vmatprep.subr.bf16.mxu0 %v1508_v18  ;;  %v285_v18 = vld [vmem:[#allocation2 + $0x7d8] sm:$0xff] }
  0xe1   :  { %v1552_v20 = vpack.c.bf16 %v285_v18, %v283_v17  ;;  %v737_v17 = vld [vmem:[#allocation2 + $0xb00] sm:$0xff]  ;;  %v739_v18 = vld [vmem:[#allocation2 + $0xb10] sm:$0xff] }
  0xe2   :  { %v1646_v21 = vpack.c.bf16 %v739_v18, %v737_v17  ;;  %v777_v17 = vld [vmem:[#allocation2 + $0xc40] sm:$0xff]  ;;  %v779_v18 = vld [vmem:[#allocation2 + $0xc50] sm:$0xff] }
  0xe3   :  { %1511 = vmatpush1.bf16.msra.mxu0 %v1510_v23  ;;  %v287_v23 = vld [vmem:[#allocation2 + $0x7e8] sm:$0xff] }
  0xe4   :  { %1513 = vmatprep.subr.bf16.mxu0 %v1512_v24  ;;  %v289_v24 = vld [vmem:[#allocation2 + $0x7f8] sm:$0xff] }
  0xe5   :  { %v1556_v26 = vpack.c.bf16 %v289_v24, %v287_v23  ;;  %v741_v23 = vld [vmem:[#allocation2 + $0xb20] sm:$0xff]  ;;  %v743_v24 = vld [vmem:[#allocation2 + $0xb30] sm:$0xff] }
  0xe7   :  { %1515 = vmatpush1.bf16.msra.mxu0 %v1514_v29  ;;  %v1558_v29 = vpack.c.bf16 %v288_v28, %v286_v27  ;;  %v1650_v27 = vpack.c.bf16 %v743_v24, %v741_v23  ;;  %v642_v23 = vld [vmem:[#allocation2 + $0x810] sm:$0xff]  ;;  %v643_v24 = vld [vmem:[#allocation2 + $0x818] sm:$0xff] }
  0xe8   :  { %1517 = vmatprep.subr.bf16.mxu0 %v1516_v30  ;;  %v32_v30 = vld [vmem:[%s2029_s0 + $0x30] sm:$0xff]  ;;  %s1951_s0 = smov [#allocation5]  }
  0xe9   :  { %s1293_s10 = sshll.u32 %s1951_s0, 4  ;;  %s1294_s10 = int_to_ptr.vmem [resolvable:$true] %s1293_s10 }
  0xea   :  { %s1922_s11 = scalar_lea.vmem %s1294_s10, 512  ;;  %p1927_p9 = scmp.lt.s32.totalorder %s1294_s10, %s1294_s10 }
  0xeb   :  { %1519 = vmatpush1.bf16.msra.mxu0 %v1518_v35  ;;  %v641_v35 = vld [vmem:[#allocation2 + $0xa58] sm:$0xff]  ;;  %p1923_p8 = scmp.ne.s32.totalorder %s1294_s10, %s1922_s11  ;;  %p1928_p10 = scmp.lt.s32.totalorder %s1922_s11, %s1922_s11 }
  0xec   :  { %1521 = vmatprep.subr.bf16.mxu0 %v1520_v36  ;;  %v1620_v36 = vpack.c.bf16 %v641_v35, %v639_v34  ;;  %v1656_v34 = vpack.c.bf16 %v752_v32, %v750_v31  ;;  %v749_v35 = vld [vmem:[#allocation2 + $0xb60] sm:$0xff]  ;;  %v873_v31 = vld [vmem:[#allocation2 + $0xc88] sm:$0xff]  ;;  %v875_v32 = vld [vmem:[#allocation2 + $0xc98] sm:$0xff] }
  0xed   :  { %p1929_p11 = por %p1928_p10, %p1927_p9 }
  0xee   :  { %1621 = vmatprep.subr.bf16.mxu1 %v1620_v36  ;;  %v751_v36 = vld [vmem:[#allocation2 + $0xb70] sm:$0xff] }
  0xef   :  { %1523 = vmatpush1.bf16.msra.mxu0 %v1522_v41  ;;  %1623 = vmatpush1.bf16.msra.mxu1 %v1622_v39  ;;  %v720_v41 = vld [vmem:[#allocation2 + $0xa78] sm:$0xff]  ;;  %v1658_v39 = vpack.c.bf16 %v751_v36, %v749_v35  ;;  %v1692_v36 = vpack.c.bf16 %v875_v32, %v873_v31  ;;  %v908_v31 = vld [vmem:[#allocation2 + $0xda0] sm:$0xff]  ;;  %v910_v32 = vld [vmem:[#allocation2 + $0xdb0] sm:$0xff]  ;;  %p1930_p12 = pnand %p1929_p11, %p1923_p8 }
  0xf0   :  { %1525 = vmatprep.subr.bf16.mxu0 %v1524_v42  ;;  %v1624_v42 = vpack.c.bf16 %v720_v41, %v718_v40  ;;  %v1660_v40 = vpack.c.bf16 %v756_v38, %v754_v37  ;;  %v753_v41 = vld [vmem:[#allocation2 + $0xb80] sm:$0xff]  ;;  %v874_v38 = vld [vmem:[#allocation2 + $0xc90] sm:$0xff] }
  0xf1   :  { %v872_v37 = vld [vmem:[#allocation2 + $0xc80] sm:$0xff] }
  0xf2   :  { %1625 = vmatprep.subr.bf16.mxu1 %v1624_v42  ;;  %v755_v42 = vld [vmem:[#allocation2 + $0xb90] sm:$0xff] }
  0xf3   :  { %1527 = vmatpush1.bf16.msra.mxu0 %v1526_v47 }
  0xf4   :  { %1529 = vmatprep.subr.bf16.mxu0 %v1528_v48  ;;  %v717_v48 = vld [vmem:[#allocation2 + $0xa60] sm:$0xff] }
  0xf7   :  { %1531 = vmatpush1.bf16.msra.mxu0 %v1530_v53 }
  0xf8   :  { %1533 = vmatprep.subr.bf16.mxu0 %v1532_v54  ;;  %v1626_v54 = vpack.c.bf16 %v719_v49, %v717_v48  ;;  %v757_v48 = vld [vmem:[#allocation2 + $0xba0] sm:$0xff]  ;;  %v759_v49 = vld [vmem:[#allocation2 + $0xbb0] sm:$0xff] }
  0xfb   :  { %1535 = vmatpush1.bf16.msra.mxu0 %v1534_v59  ;;  %v726_v59 = vld [vmem:[#allocation2 + $0xaa8] sm:$0xff] }
  0xfc   :  { %1537 = vmatprep.subr.bf16.mxu0 %v1536_v60  ;;  %v728_v60 = vld [vmem:[#allocation2 + $0xab8] sm:$0xff] }
  0xfd   :  { %v1632_v62 = vpack.c.bf16 %v728_v60, %v726_v59  ;;  %v766_v59 = vld [vmem:[#allocation2 + $0xbe8] sm:$0xff]  ;;  %v768_v60 = vld [vmem:[#allocation2 + $0xbf8] sm:$0xff] }
  0xff   :  { %1539 = vmatpush1.bf16.msra.mxu0 %v1538_v1  ;;  %v730_v1 = vld [vmem:[#allocation2 + $0xac8] sm:$0xff] }
 0x100   :  { %1541 = vmatprep.subr.bf16.mxu0 %v1540_v2  ;;  %v732_v2 = vld [vmem:[#allocation2 + $0xad8] sm:$0xff] }
 0x101   :  { %v1636_v4 = vpack.c.bf16 %v732_v2, %v730_v1  ;;  %v770_v1 = vld [vmem:[#allocation2 + $0xc08] sm:$0xff]  ;;  %v772_v2 = vld [vmem:[#allocation2 + $0xc18] sm:$0xff] }
 0x103   :  { %1543 = vmatpush1.bf16.msra.mxu0 %v1542_v7  ;;  %v734_v7 = vld [vmem:[#allocation2 + $0xae8] sm:$0xff] }
 0x104   :  { %1545 = vmatprep.subr.bf16.mxu0 %v1544_v8  ;;  %v736_v8 = vld [vmem:[#allocation2 + $0xaf8] sm:$0xff] }
 0x105   :  { %v1640_v10 = vpack.c.bf16 %v736_v8, %v734_v7  ;;  %v774_v7 = vld [vmem:[#allocation2 + $0xc28] sm:$0xff]  ;;  %v776_v8 = vld [vmem:[#allocation2 + $0xc38] sm:$0xff] }
 0x107   :  { %1547 = vmatpush1.bf16.msra.mxu0 %v1546_v13  ;;  %v738_v13 = vld [vmem:[#allocation2 + $0xb08] sm:$0xff] }
 0x108   :  { %1549 = vmatprep.subr.bf16.mxu0 %v1548_v14  ;;  %v740_v14 = vld [vmem:[#allocation2 + $0xb18] sm:$0xff] }
 0x109   :  { %v1644_v16 = vpack.c.bf16 %v740_v14, %v738_v13  ;;  %v1682_v13 = vpack.c.bf16 %v775_v12, %v773_v11  ;;  %v778_v14 = vld [vmem:[#allocation2 + $0xc48] sm:$0xff] }
 0x10b   :  { %1551 = vmatpush1.bf16.msra.mxu0 %v1550_v19  ;;  %v742_v19 = vld [vmem:[#allocation2 + $0xb28] sm:$0xff] }
 0x10c   :  { %1553 = vmatprep.subr.bf16.mxu0 %v1552_v20  ;;  %v744_v20 = vld [vmem:[#allocation2 + $0xb38] sm:$0xff] }
 0x10d   :  { %v1648_v22 = vpack.c.bf16 %v744_v20, %v742_v19  ;;  %v1686_v19 = vpack.c.bf16 %v779_v18, %v777_v17  ;;  %v869_v20 = vld [vmem:[#allocation2 + $0xc68] sm:$0xff]  ;;  %v903_v17 = vld [vmem:[#allocation2 + $0xd78] sm:$0xff] }
 0x10f   :  { %1555 = vmatpush1.bf16.msra.mxu0 %v1554_v25  ;;  %v746_v25 = vld [vmem:[#allocation2 + $0xb48] sm:$0xff] }
 0x110   :  { %1557 = vmatprep.subr.bf16.mxu0 %v1556_v26  ;;  %v748_v26 = vld [vmem:[#allocation2 + $0xb58] sm:$0xff] }
 0x111   :  { %v1652_v28 = vpack.c.bf16 %v748_v26, %v746_v25 }
 0x113   :  { %1559 = vmatpush1.bf16.msra.mxu0 %v1558_v29  ;;  %v745_v29 = vld [vmem:[#allocation2 + $0xb40] sm:$0xff] }
 0x116   :  { %570 = vmatmul.mubr.f32.vlgmr.msra.gmra.mrb[0].mxu0 %v32_v30  ;;  %v747_v30 = vld [vmem:[#allocation2 + $0xb50] sm:$0xff] }
 0x117   :  { %v1654_v33 = vpack.c.bf16 %v747_v30, %v745_v29  ;;  %v870_v29 = vld [vmem:[#allocation2 + $0xc70] sm:$0xff] }
 0x1e9   :  { %v571_v45 = vpop.f32.mrb[0].mxu0 }
 0x1ea   :  { %v2003_v46 = vadd.f32 %v571_v45, %v290_v43  ;;  %v573_v47 = vpop.f32.mrb[1].mxu0  ;;  %v758_v43 = vld [vmem:[#allocation2 + $0xba8] sm:$0xff]  ;;  %v1662_v45 = vpack.c.bf16 %v755_v42, %v753_v41  ;;  %v1694_v41 = vpack.c.bf16 %v874_v38, %v872_v37  ;;  %v912_v37 = vld [vmem:[#allocation2 + $0xdc0] sm:$0xff]  ;;  %v914_v38 = vld [vmem:[#allocation2 + $0xdd0] sm:$0xff] }
 0x1eb   :  { %v2005_v50 = vadd.f32 %v573_v47, %v291_v44  ;;  %v760_v44 = vld [vmem:[#allocation2 + $0xbb8] sm:$0xff] }
 0x1ec   :  { %v576_v55 = vmax.f32 %v2003_v46, 0.0  ;;  %v1664_v47 = vpack.c.bf16 %v760_v44, %v758_v43  ;;  %v876_v43 = vld [vmem:[#allocation2 + $0xca0] sm:$0xff]  ;;  %v878_v44 = vld [vmem:[#allocation2 + $0xcb0] sm:$0xff] }
 0x1ed   :  { %v577_v53 = vmax.f32 %v2005_v50, 0.0  ;;  %v1022_v50 = vld [vmem:[#allocation2 + $0xed8] sm:$0xff] }
 0x1ef   :  { %708 = vmatprep.mubr.f32.mxu1 %v577_v53 }
 0x1f0   :  { %709 = vmatmul.mubr.f32.vlgmr.msra.gmra.mrb[0].mxu1 %v576_v55 }
 0x1f1   :  { %1627 = vmatpush1.bf16.msra.mxu1 %v1626_v54  ;;  %v1666_v54 = vpack.c.bf16 %v759_v49, %v757_v48  ;;  %v1698_v48 = vpack.c.bf16 %v878_v44, %v876_v43  ;;  %v916_v43 = vld [vmem:[#allocation2 + $0xde0] sm:$0xff]  ;;  %v918_v44 = vld [vmem:[#allocation2 + $0xdf0] sm:$0xff] }
 0x1f2   :  { %1629 = vmatprep.subr.bf16.mxu1 %v1628_v56  ;;  %v1668_v56 = vpack.c.bf16 %v764_v52, %v762_v51  ;;  %v880_v51 = vld [vmem:[#allocation2 + $0xcc0] sm:$0xff]  ;;  %v882_v52 = vld [vmem:[#allocation2 + $0xcd0] sm:$0xff] }
 0x1f5   :  { %1631 = vmatpush1.bf16.msra.mxu1 %v1630_v61  ;;  %v1670_v61 = vpack.c.bf16 %v763_v58, %v761_v57  ;;  %v1702_v57 = vpack.c.bf16 %v882_v52, %v880_v51  ;;  %v920_v51 = vld [vmem:[#allocation2 + $0xe00] sm:$0xff]  ;;  %v922_v52 = vld [vmem:[#allocation2 + $0xe10] sm:$0xff] }
 0x1f6   :  { %1633 = vmatprep.subr.bf16.mxu1 %v1632_v62  ;;  %v1672_v62 = vpack.c.bf16 %v768_v60, %v766_v59  ;;  %v884_v59 = vld [vmem:[#allocation2 + $0xce0] sm:$0xff]  ;;  %v886_v60 = vld [vmem:[#allocation2 + $0xcf0] sm:$0xff] }
 0x1f9   :  { %1635 = vmatpush1.bf16.msra.mxu1 %v1634_v3  ;;  %v1674_v3 = vpack.c.bf16 %v767_v0, %v765_v63  ;;  %v1706_v63 = vpack.c.bf16 %v886_v60, %v884_v59  ;;  %v926_v59 = vld [vmem:[#allocation2 + $0xe30] sm:$0xff] }
 0x1fa   :  { %1637 = vmatprep.subr.bf16.mxu1 %v1636_v4  ;;  %v1676_v4 = vpack.c.bf16 %v772_v2, %v770_v1  ;;  %v888_v1 = vld [vmem:[#allocation2 + $0xd00] sm:$0xff]  ;;  %v890_v2 = vld [vmem:[#allocation2 + $0xd10] sm:$0xff] }
 0x1fd   :  { %1639 = vmatpush1.bf16.msra.mxu1 %v1638_v9  ;;  %v1678_v9 = vpack.c.bf16 %v771_v6, %v769_v5  ;;  %v1710_v5 = vpack.c.bf16 %v890_v2, %v888_v1  ;;  %v928_v1 = vld [vmem:[#allocation2 + $0xe40] sm:$0xff]  ;;  %v930_v2 = vld [vmem:[#allocation2 + $0xe50] sm:$0xff] }
 0x1fe   :  { %1641 = vmatprep.subr.bf16.mxu1 %v1640_v10  ;;  %v1680_v10 = vpack.c.bf16 %v776_v8, %v774_v7  ;;  %v892_v7 = vld [vmem:[#allocation2 + $0xd20] sm:$0xff]  ;;  %v894_v8 = vld [vmem:[#allocation2 + $0xd30] sm:$0xff] }
 0x1ff   :  { %v1714_v11 = vpack.c.bf16 %v894_v8, %v892_v7  ;;  %v781_v7 = vld [vmem:[#allocation2 + $0x820] sm:$0xff]  ;;  %v782_v8 = vld [vmem:[#allocation2 + $0x828] sm:$0xff] }
 0x201   :  { %1643 = vmatpush1.bf16.msra.mxu1 %v1642_v15  ;;  %v780_v15 = vld [vmem:[#allocation2 + $0xc58] sm:$0xff] }
 0x202   :  { %1645 = vmatprep.subr.bf16.mxu1 %v1644_v16  ;;  %v1684_v16 = vpack.c.bf16 %v780_v15, %v778_v14  ;;  %v898_v14 = vld [vmem:[#allocation2 + $0xd50] sm:$0xff] }
 0x205   :  { %1647 = vmatpush1.bf16.msra.mxu1 %v1646_v21  ;;  %v871_v21 = vld [vmem:[#allocation2 + $0xc78] sm:$0xff] }
 0x206   :  { %1649 = vmatprep.subr.bf16.mxu1 %v1648_v22  ;;  %v1688_v22 = vpack.c.bf16 %v871_v21, %v869_v20  ;;  %v902_v20 = vld [vmem:[#allocation2 + $0xd70] sm:$0xff] }
 0x209   :  { %1651 = vmatpush1.bf16.msra.mxu1 %v1650_v27 }
 0x20a   :  { %1653 = vmatprep.subr.bf16.mxu1 %v1652_v28  ;;  %v868_v28 = vld [vmem:[#allocation2 + $0xc60] sm:$0xff] }
 0x20d   :  { %1655 = vmatpush1.bf16.msra.mxu1 %v1654_v33 }
 0x20e   :  { %1657 = vmatprep.subr.bf16.mxu1 %v1656_v34  ;;  %v1690_v34 = vpack.c.bf16 %v870_v29, %v868_v28  ;;  %v909_v28 = vld [vmem:[#allocation2 + $0xda8] sm:$0xff]  ;;  %v911_v29 = vld [vmem:[#allocation2 + $0xdb8] sm:$0xff] }
 0x211   :  { %1659 = vmatpush1.bf16.msra.mxu1 %v1658_v39  ;;  %v877_v39 = vld [vmem:[#allocation2 + $0xca8] sm:$0xff] }
 0x212   :  { %1661 = vmatprep.subr.bf16.mxu1 %v1660_v40  ;;  %v879_v40 = vld [vmem:[#allocation2 + $0xcb8] sm:$0xff] }
 0x213   :  { %v1696_v42 = vpack.c.bf16 %v879_v40, %v877_v39  ;;  %v1734_v39 = vpack.c.bf16 %v914_v38, %v912_v37  ;;  %v917_v40 = vld [vmem:[#allocation2 + $0xde8] sm:$0xff]  ;;  %v1021_v38 = vld [vmem:[#allocation2 + $0xed0] sm:$0xff] }
 0x214   :  { %v1020_v37 = vld [vmem:[#allocation2 + $0xec8] sm:$0xff] }
 0x215   :  { %1663 = vmatpush1.bf16.msra.mxu1 %v1662_v45  ;;  %v881_v45 = vld [vmem:[#allocation2 + $0xcc8] sm:$0xff]  ;;  %v1764_v46 = vpack.c.bf16 %v1022_v50, %v1020_v37  ;;  %v1059_v37 = vld [vmem:[#allocation2 + $0x1000] sm:$0xff]  ;;  %v1061_v50 = vld [vmem:[#allocation2 + $0x1010] sm:$0xff] }
 0x216   :  { %1665 = vmatprep.subr.bf16.mxu1 %v1664_v47  ;;  %v883_v47 = vld [vmem:[#allocation2 + $0xcd8] sm:$0xff] }
 0x217   :  { %v1700_v49 = vpack.c.bf16 %v883_v47, %v881_v45  ;;  %v1738_v45 = vpack.c.bf16 %v918_v44, %v916_v43  ;;  %v921_v47 = vld [vmem:[#allocation2 + $0xe08] sm:$0xff]  ;;  %v1023_v43 = vld [vmem:[#allocation2 + $0xee0] sm:$0xff]  ;;  %v1025_v44 = vld [vmem:[#allocation2 + $0xef0] sm:$0xff] }
 0x219   :  { %1667 = vmatpush1.bf16.msra.mxu1 %v1666_v54  ;;  %v885_v54 = vld [vmem:[#allocation2 + $0xce8] sm:$0xff] }
 0x21a   :  { %1669 = vmatprep.subr.bf16.mxu1 %v1668_v56  ;;  %v887_v56 = vld [vmem:[#allocation2 + $0xcf8] sm:$0xff] }
 0x21b   :  { %v1704_v58 = vpack.c.bf16 %v887_v56, %v885_v54  ;;  %v925_v54 = vld [vmem:[#allocation2 + $0xe28] sm:$0xff]  ;;  %v1742_v56 = vpack.c.bf16 %v922_v52, %v920_v51  ;;  %v1027_v51 = vld [vmem:[#allocation2 + $0xf00] sm:$0xff]  ;;  %v1029_v52 = vld [vmem:[#allocation2 + $0xf10] sm:$0xff] }
 0x21d   :  { %1671 = vmatpush1.bf16.msra.mxu1 %v1670_v61  ;;  %v889_v61 = vld [vmem:[#allocation2 + $0xd08] sm:$0xff] }
 0x21e   :  { %1673 = vmatprep.subr.bf16.mxu1 %v1672_v62  ;;  %v891_v62 = vld [vmem:[#allocation2 + $0xd18] sm:$0xff] }
 0x21f   :  { %v1708_v0 = vpack.c.bf16 %v891_v62, %v889_v61  ;;  %v929_v61 = vld [vmem:[#allocation2 + $0xe48] sm:$0xff]  ;;  %v931_v62 = vld [vmem:[#allocation2 + $0xe58] sm:$0xff] }
 0x221   :  { %1675 = vmatpush1.bf16.msra.mxu1 %v1674_v3  ;;  %v893_v3 = vld [vmem:[#allocation2 + $0xd28] sm:$0xff] }
 0x222   :  { %1677 = vmatprep.subr.bf16.mxu1 %v1676_v4  ;;  %v895_v4 = vld [vmem:[#allocation2 + $0xd38] sm:$0xff] }
 0x223   :  { %v1712_v6 = vpack.c.bf16 %v895_v4, %v893_v3  ;;  %v1750_v3 = vpack.c.bf16 %v930_v2, %v928_v1  ;;  %v1008_v4 = vld [vmem:[#allocation2 + $0xe68] sm:$0xff]  ;;  %v1035_v1 = vld [vmem:[#allocation2 + $0xf40] sm:$0xff]  ;;  %v1037_v2 = vld [vmem:[#allocation2 + $0xf50] sm:$0xff] }
 0x225   :  { %1679 = vmatpush1.bf16.msra.mxu1 %v1678_v9  ;;  %v897_v9 = vld [vmem:[#allocation2 + $0xd48] sm:$0xff] }
 0x226   :  { %1681 = vmatprep.subr.bf16.mxu1 %v1680_v10  ;;  %v899_v10 = vld [vmem:[#allocation2 + $0xd58] sm:$0xff] }
 0x227   :  { %v1716_v12 = vpack.c.bf16 %v899_v10, %v897_v9 }
 0x229   :  { %1683 = vmatpush1.bf16.msra.mxu1 %v1682_v13  ;;  %v896_v13 = vld [vmem:[#allocation2 + $0xd40] sm:$0xff] }
 0x22a   :  { %1685 = vmatprep.subr.bf16.mxu1 %v1684_v16  ;;  %v1718_v15 = vpack.c.bf16 %v898_v14, %v896_v13  ;;  %v901_v16 = vld [vmem:[#allocation2 + $0xd68] sm:$0xff] }
 0x22b   :  { %v1720_v18 = vpack.c.bf16 %v903_v17, %v901_v16 }
 0x22d   :  { %1687 = vmatpush1.bf16.msra.mxu1 %v1686_v19  ;;  %v900_v19 = vld [vmem:[#allocation2 + $0xd60] sm:$0xff] }
 0x22e   :  { %1689 = vmatprep.subr.bf16.mxu1 %v1688_v22  ;;  %v1722_v21 = vpack.c.bf16 %v902_v20, %v900_v19  ;;  %v905_v22 = vld [vmem:[#allocation2 + $0xd88] sm:$0xff]  ;;  %v1007_v19 = vld [vmem:[#allocation2 + $0xe60] sm:$0xff]  ;;  %v1009_v20 = vld [vmem:[#allocation2 + $0xe70] sm:$0xff] }
 0x2c3   :  { %v710_v25 = vpop.f32.mrb[0].mxu1 }
 0x2c4   :  { %v711_v26 = vadd.f32 %v710_v25, %v642_v23  ;;  %v712_v27 = vpop.f32.mrb[1].mxu1  ;;  %v907_v23 = vld [vmem:[#allocation2 + $0xd98] sm:$0xff]  ;;  %v904_v25 = vld [vmem:[#allocation2 + $0xd80] sm:$0xff] }
 0x2c5   :  { %v713_v30 = vadd.f32 %v712_v27, %v643_v24  ;;  %v1724_v24 = vpack.c.bf16 %v907_v23, %v905_v22  ;;  %v1012_v22 = vld [vmem:[#allocation2 + $0xe88] sm:$0xff]  ;;  %v1014_v23 = vld [vmem:[#allocation2 + $0xe98] sm:$0xff] }
 0x2c6   :  { %v715_v35 = vmax.f32 %v711_v26, 0.0  ;;  %v906_v26 = vld [vmem:[#allocation2 + $0xd90] sm:$0xff] }
 0x2c7   :  { %v716_v33 = vmax.f32 %v713_v30, 0.0  ;;  %v1726_v27 = vpack.c.bf16 %v906_v26, %v904_v25  ;;  %v1728_v30 = vpack.c.bf16 %v911_v29, %v909_v28  ;;  %v1754_v26 = vpack.c.bf16 %v1009_v20, %v1007_v19  ;;  %v1011_v29 = vld [vmem:[#allocation2 + $0xe80] sm:$0xff]  ;;  %v1049_v20 = vld [vmem:[#allocation2 + $0xfb0] sm:$0xff] }
 0x2c8   :  { %v1756_v28 = vpack.c.bf16 %v1014_v23, %v1012_v22  ;;  %v1047_v19 = vld [vmem:[#allocation2 + $0xfa0] sm:$0xff]  ;;  %v1054_v22 = vld [vmem:[#allocation2 + $0xfd8] sm:$0xff] }
 0x2c9   :  { %847 = vmatprep.mubr.f32.mxu1 %v716_v33  ;;  %v1730_v33 = vpack.c.bf16 %v910_v32, %v908_v31  ;;  %v1016_v31 = vld [vmem:[#allocation2 + $0xea8] sm:$0xff]  ;;  %v1018_v32 = vld [vmem:[#allocation2 + $0xeb8] sm:$0xff]  ;;  %v1794_v23 = vpack.c.bf16 %v1049_v20, %v1047_v19 }
 0x2ca   :  { %848 = vmatmul.mubr.f32.vlgmr.msra.gmra.mrb[2].mxu1 %v715_v35  ;;  %v915_v35 = vld [vmem:[#allocation2 + $0xdd8] sm:$0xff] }
 0x2cb   :  { %1691 = vmatpush1.bf16.msra.mxu1 %v1690_v34  ;;  %v913_v34 = vld [vmem:[#allocation2 + $0xdc8] sm:$0xff] }
 0x2cc   :  { %1693 = vmatprep.subr.bf16.mxu1 %v1692_v36  ;;  %v1732_v36 = vpack.c.bf16 %v915_v35, %v913_v34  ;;  %v1760_v34 = vpack.c.bf16 %v1018_v32, %v1016_v31  ;;  %v1015_v35 = vld [vmem:[#allocation2 + $0xea0] sm:$0xff]  ;;  %v1057_v32 = vld [vmem:[#allocation2 + $0xff0] sm:$0xff] }
 0x2cd   :  { %v1055_v31 = vld [vmem:[#allocation2 + $0xfe0] sm:$0xff] }
 0x2cf   :  { %1695 = vmatpush1.bf16.msra.mxu1 %v1694_v41  ;;  %v919_v41 = vld [vmem:[#allocation2 + $0xdf8] sm:$0xff] }
 0x2d0   :  { %1697 = vmatprep.subr.bf16.mxu1 %v1696_v42  ;;  %v1736_v42 = vpack.c.bf16 %v919_v41, %v917_v40  ;;  %v1026_v40 = vld [vmem:[#allocation2 + $0xef8] sm:$0xff] }
 0x2d3   :  { %1699 = vmatpush1.bf16.msra.mxu1 %v1698_v48  ;;  %v923_v48 = vld [vmem:[#allocation2 + $0xe18] sm:$0xff] }
 0x2d4   :  { %1701 = vmatprep.subr.bf16.mxu1 %v1700_v49  ;;  %v1740_v49 = vpack.c.bf16 %v923_v48, %v921_v47  ;;  %v1030_v47 = vld [vmem:[#allocation2 + $0xf18] sm:$0xff]  ;;  %v1770_v48 = vpack.c.bf16 %v1025_v44, %v1023_v43 }
 0x2d5   :  { %v1070_v43 = vld [vmem:[#allocation2 + $0x1058] sm:$0xff] }
 0x2d7   :  { %1703 = vmatpush1.bf16.msra.mxu1 %v1702_v57  ;;  %v927_v57 = vld [vmem:[#allocation2 + $0xe38] sm:$0xff] }
 0x2d8   :  { %1705 = vmatprep.subr.bf16.mxu1 %v1704_v58  ;;  %v924_v58 = vld [vmem:[#allocation2 + $0xe20] sm:$0xff]  ;;  %v1744_v60 = vpack.c.bf16 %v927_v57, %v925_v54  ;;  %v1032_v54 = vld [vmem:[#allocation2 + $0xf28] sm:$0xff]  ;;  %v1774_v57 = vpack.c.bf16 %v1029_v52, %v1027_v51  ;;  %v1149_v51 = vld [vmem:[#allocation2 + $0x1078] sm:$0xff] }
 0x2d9   :  { %v1146_v52 = vld [vmem:[#allocation2 + $0x1060] sm:$0xff] }
 0x2db   :  { %1707 = vmatpush1.bf16.msra.mxu1 %v1706_v63  ;;  %v1746_v63 = vpack.c.bf16 %v926_v59, %v924_v58  ;;  %v1031_v59 = vld [vmem:[#allocation2 + $0xf20] sm:$0xff] }
 0x2dc   :  { %1709 = vmatprep.subr.bf16.mxu1 %v1708_v0  ;;  %v1748_v0 = vpack.c.bf16 %v931_v62, %v929_v61  ;;  %v1036_v61 = vld [vmem:[#allocation2 + $0xf48] sm:$0xff]  ;;  %v1038_v62 = vld [vmem:[#allocation2 + $0xf58] sm:$0xff] }
 0x2df   :  { %1711 = vmatpush1.bf16.msra.mxu1 %v1710_v5  ;;  %v1010_v5 = vld [vmem:[#allocation2 + $0xe78] sm:$0xff] }
 0x2e0   :  { %1713 = vmatprep.subr.bf16.mxu1 %v1712_v6  ;;  %v1752_v6 = vpack.c.bf16 %v1010_v5, %v1008_v4  ;;  %v1042_v4 = vld [vmem:[#allocation2 + $0xf78] sm:$0xff]  ;;  %v1782_v5 = vpack.c.bf16 %v1037_v2, %v1035_v1 }
 0x2e3   :  { %1715 = vmatpush1.bf16.msra.mxu1 %v1714_v11 }
 0x2e4   :  { %1717 = vmatprep.subr.bf16.mxu1 %v1716_v12 }
 0x2e7   :  { %1719 = vmatpush1.bf16.msra.mxu1 %v1718_v15 }
 0x2e8   :  { %1721 = vmatprep.subr.bf16.mxu1 %v1720_v18 }
 0x2eb   :  { %1723 = vmatpush1.bf16.msra.mxu1 %v1722_v21 }
 0x2ec   :  { %1725 = vmatprep.subr.bf16.mxu1 %v1724_v24 }
 0x2ef   :  { %1727 = vmatpush1.bf16.msra.mxu1 %v1726_v27 }
 0x2f0   :  { %1729 = vmatprep.subr.bf16.mxu1 %v1728_v30  ;;  %v1013_v30 = vld [vmem:[#allocation2 + $0xe90] sm:$0xff] }
 0x2f3   :  { %1731 = vmatpush1.bf16.msra.mxu1 %v1730_v33  ;;  %v1758_v33 = vpack.c.bf16 %v1013_v30, %v1011_v29 }
 0x2f4   :  { %1733 = vmatprep.subr.bf16.mxu1 %v1732_v36  ;;  %v1017_v36 = vld [vmem:[#allocation2 + $0xeb0] sm:$0xff] }
 0x2f7   :  { %1735 = vmatpush1.bf16.msra.mxu1 %v1734_v39  ;;  %v1024_v39 = vld [vmem:[#allocation2 + $0xee8] sm:$0xff] }
 0x2f8   :  { %1737 = vmatprep.subr.bf16.mxu1 %v1736_v42  ;;  %v1768_v42 = vpack.c.bf16 %v1026_v40, %v1024_v39  ;;  %v1063_v39 = vld [vmem:[#allocation2 + $0x1020] sm:$0xff]  ;;  %v1065_v40 = vld [vmem:[#allocation2 + $0x1030] sm:$0xff] }
 0x2fb   :  { %1739 = vmatpush1.bf16.msra.mxu1 %v1738_v45  ;;  %v1028_v45 = vld [vmem:[#allocation2 + $0xf08] sm:$0xff] }
 0x2fc   :  { %1741 = vmatprep.subr.bf16.mxu1 %v1740_v49  ;;  %v1772_v49 = vpack.c.bf16 %v1030_v47, %v1028_v45  ;;  %v1067_v45 = vld [vmem:[#allocation2 + $0x1040] sm:$0xff]  ;;  %v1069_v47 = vld [vmem:[#allocation2 + $0x1050] sm:$0xff] }
 0x2ff   :  { %1743 = vmatpush1.bf16.msra.mxu1 %v1742_v56  ;;  %v1034_v56 = vld [vmem:[#allocation2 + $0xf38] sm:$0xff] }
 0x300   :  { %1745 = vmatprep.subr.bf16.mxu1 %v1744_v60  ;;  %v1776_v58 = vpack.c.bf16 %v1034_v56, %v1032_v54  ;;  %v1033_v60 = vld [vmem:[#allocation2 + $0xf30] sm:$0xff] }
 0x301   :  { %v1148_v56 = vld [vmem:[#allocation2 + $0x1070] sm:$0xff] }
 0x303   :  { %1747 = vmatpush1.bf16.msra.mxu1 %v1746_v63  ;;  %v1778_v63 = vpack.c.bf16 %v1033_v60, %v1031_v59  ;;  %v1818_v59 = vpack.c.bf16 %v1148_v56, %v1146_v52  ;;  %v1193_v52 = vld [vmem:[#allocation2 + $0x11d8] sm:$0xff] }
 0x304   :  { %1749 = vmatprep.subr.bf16.mxu1 %v1748_v0  ;;  %v1780_v0 = vpack.c.bf16 %v1038_v62, %v1036_v61  ;;  %v1150_v61 = vld [vmem:[#allocation2 + $0x1080] sm:$0xff]  ;;  %v1152_v62 = vld [vmem:[#allocation2 + $0x1090] sm:$0xff] }
 0x305   :  { %v1822_v1 = vpack.c.bf16 %v1152_v62, %v1150_v61 }
 0x307   :  { %1751 = vmatpush1.bf16.msra.mxu1 %v1750_v3  ;;  %v1040_v3 = vld [vmem:[#allocation2 + $0xf68] sm:$0xff] }
 0x308   :  { %1753 = vmatprep.subr.bf16.mxu1 %v1752_v6  ;;  %v1784_v6 = vpack.c.bf16 %v1042_v4, %v1040_v3  ;;  %v1154_v3 = vld [vmem:[#allocation2 + $0x10a0] sm:$0xff]  ;;  %v1156_v4 = vld [vmem:[#allocation2 + $0x10b0] sm:$0xff] }
 0x39d   :  { %v849_v9 = vpop.f32.mrb[2].mxu1 }
 0x39e   :  { %v850_v10 = vadd.f32 %v849_v9, %v781_v7  ;;  %v851_v11 = vpop.f32.mrb[3].mxu1  ;;  %v1039_v7 = vld [vmem:[#allocation2 + $0xf60] sm:$0xff]  ;;  %v1044_v9 = vld [vmem:[#allocation2 + $0xf88] sm:$0xff] }
 0x39f   :  { %v852_v12 = vadd.f32 %v851_v11, %v782_v8  ;;  %v1041_v8 = vld [vmem:[#allocation2 + $0xf70] sm:$0xff] }
 0x3a0   :  { %v1302_v13 = vmul.f32 -1.442695, %v850_v10  ;;  %v1046_v10 = vld [vmem:[#allocation2 + $0xf98] sm:$0xff]  ;;  %v1786_v11 = vpack.c.bf16 %v1041_v8, %v1039_v7  ;;  %v1826_v7 = vpack.c.bf16 %v1156_v4, %v1154_v3 }
 0x3a1   :  { %v1303_v14 = vmul.f32 -1.442695, %v852_v12  ;;  %v1788_v12 = vpack.c.bf16 %v1046_v10, %v1044_v9  ;;  %v1158_v9 = vld [vmem:[#allocation2 + $0x10c0] sm:$0xff]  ;;  %v1160_v10 = vld [vmem:[#allocation2 + $0x10d0] sm:$0xff] }
 0x3a2   :  { %1892 = vpow2.f32 %v1302_v13  ;;  %v1043_v13 = vld [vmem:[#allocation2 + $0xf80] sm:$0xff] }
 0x3a3   :  { %1894 = vpow2.f32 %v1303_v14  ;;  %v1045_v14 = vld [vmem:[#allocation2 + $0xf90] sm:$0xff] }
 0x3ac   :  { %v1893_v15 = vpop.eup %1892 }
 0x3ad   :  { %v1895_v16 = vpop.eup %1894  ;;  %v860_v17 = vadd.f32 1.0, %v1893_v15  ;;  %v1048_v15 = vld [vmem:[#allocation2 + $0xfa8] sm:$0xff] }
 0x3ae   :  { %v861_v18 = vadd.f32 1.0, %v1895_v16  ;;  %v1050_v16 = vld [vmem:[#allocation2 + $0xfb8] sm:$0xff] }
 0x3af   :  { %1896 = vrcp.f32 %v860_v17  ;;  %v1790_v17 = vpack.c.bf16 %v1045_v14, %v1043_v13  ;;  %v1830_v13 = vpack.c.bf16 %v1160_v10, %v1158_v9 }
 0x3b0   :  { %1898 = vrcp.f32 %v861_v18  ;;  %v1792_v18 = vpack.c.bf16 %v1050_v16, %v1048_v15  ;;  %v1162_v15 = vld [vmem:[#allocation2 + $0x10e0] sm:$0xff]  ;;  %v1164_v16 = vld [vmem:[#allocation2 + $0x10f0] sm:$0xff] }
 0x3b1   :  { %v1834_v19 = vpack.c.bf16 %v1164_v16, %v1162_v15 }
 0x3b9   :  { %v1897_v21 = vpop.eup %1896 }
 0x3ba   :  { %v1899_v24 = vpop.eup %1898  ;;  %v866_v27 = vmul.f32 %v1897_v21, %v576_v55  ;;  %v1019_v55 = vld [vmem:[#allocation2 + $0xec0] sm:$0xff]  ;;  %v1052_v21 = vld [vmem:[#allocation2 + $0xfc8] sm:$0xff] }
 0x3bb   :  { %v867_v25 = vmul.f32 %v1899_v24, %v577_v53  ;;  %v1762_v53 = vpack.c.bf16 %v1017_v36, %v1015_v35  ;;  %v1766_v41 = vpack.c.bf16 %v1021_v38, %v1019_v55  ;;  %v1796_v24 = vpack.c.bf16 %v1054_v22, %v1052_v21  ;;  %v1166_v21 = vld [vmem:[#allocation2 + $0x1100] sm:$0xff]  ;;  %v1168_v22 = vld [vmem:[#allocation2 + $0x1110] sm:$0xff] }
 0x3bc   :  { %v1802_v35 = vpack.c.bf16 %v1057_v32, %v1055_v31  ;;  %v1806_v55 = vpack.c.bf16 %v1061_v50, %v1059_v37 }
 0x3bd   :  { %998 = vmatprep.mubr.f32.mxu1 %v867_v25  ;;  %v1051_v25 = vld [vmem:[#allocation2 + $0xfc0] sm:$0xff] }
 0x3be   :  { %999 = vmatmul.mubr.f32.vlgmr.msra.gmra.mrb[4].mxu1 %v866_v27  ;;  %v1056_v27 = vld [vmem:[#allocation2 + $0xfe8] sm:$0xff] }
 0x3bf   :  { %1755 = vmatpush1.bf16.msra.mxu1 %v1754_v26  ;;  %v1053_v26 = vld [vmem:[#allocation2 + $0xfd0] sm:$0xff] }
 0x3c0   :  { %1757 = vmatprep.subr.bf16.mxu1 %v1756_v28  ;;  %v1058_v28 = vld [vmem:[#allocation2 + $0xff8] sm:$0xff]  ;;  %v1798_v29 = vpack.c.bf16 %v1053_v26, %v1051_v25  ;;  %v1838_v25 = vpack.c.bf16 %v1168_v22, %v1166_v21  ;;  %v1207_v22 = vld [vmem:[#allocation2 + $0x1248] sm:$0xff] }
 0x3c1   :  { %v1800_v30 = vpack.c.bf16 %v1058_v28, %v1056_v27  ;;  %v1170_v27 = vld [vmem:[#allocation2 + $0x1120] sm:$0xff]  ;;  %v1172_v28 = vld [vmem:[#allocation2 + $0x1130] sm:$0xff] }
 0x3c2   :  { %v1842_v31 = vpack.c.bf16 %v1172_v28, %v1170_v27  ;;  %v1071_v28 = vld [vmem:[#allocation2 + $0x840] sm:$0xff] }
 0x3c3   :  { %1759 = vmatpush1.bf16.msra.mxu1 %v1758_v33  ;;  %v1060_v33 = vld [vmem:[#allocation2 + $0x1008] sm:$0xff] }
 0x3c4   :  { %1761 = vmatprep.subr.bf16.mxu1 %v1760_v34  ;;  %v1062_v34 = vld [vmem:[#allocation2 + $0x1018] sm:$0xff] }
 0x3c5   :  { %v1804_v36 = vpack.c.bf16 %v1062_v34, %v1060_v33  ;;  %v1174_v33 = vld [vmem:[#allocation2 + $0x1140] sm:$0xff]  ;;  %v1176_v34 = vld [vmem:[#allocation2 + $0x1150] sm:$0xff] }
 0x3c6   :  { %v1846_v37 = vpack.c.bf16 %v1176_v34, %v1174_v33 }
 0x3c7   :  { %1763 = vmatpush1.bf16.msra.mxu1 %v1762_v53  ;;  %v1064_v53 = vld [vmem:[#allocation2 + $0x1028] sm:$0xff] }
 0x3c8   :  { %1765 = vmatprep.subr.bf16.mxu1 %v1764_v46  ;;  %v1066_v46 = vld [vmem:[#allocation2 + $0x1038] sm:$0xff] }
 0x3c9   :  { %v1808_v38 = vpack.c.bf16 %v1066_v46, %v1064_v53  ;;  %v1178_v53 = vld [vmem:[#allocation2 + $0x1160] sm:$0xff]  ;;  %v1180_v46 = vld [vmem:[#allocation2 + $0x1170] sm:$0xff] }
 0x3cb   :  { %1767 = vmatpush1.bf16.msra.mxu1 %v1766_v41  ;;  %v1810_v41 = vpack.c.bf16 %v1065_v40, %v1063_v39  ;;  %v1850_v39 = vpack.c.bf16 %v1180_v46, %v1178_v53 }
 0x3cc   :  { %1769 = vmatprep.subr.bf16.mxu1 %v1768_v42  ;;  %v1068_v42 = vld [vmem:[#allocation2 + $0x1048] sm:$0xff] }
 0x3cd   :  { %v1812_v44 = vpack.c.bf16 %v1070_v43, %v1068_v42  ;;  %v1184_v42 = vld [vmem:[#allocation2 + $0x1190] sm:$0xff]  ;;  %v1187_v43 = vld [vmem:[#allocation2 + $0x11a8] sm:$0xff] }
 0x3cf   :  { %1771 = vmatpush1.bf16.msra.mxu1 %v1770_v48  ;;  %v1814_v48 = vpack.c.bf16 %v1069_v47, %v1067_v45 }
 0x3d0   :  { %1773 = vmatprep.subr.bf16.mxu1 %v1772_v49  ;;  %v1147_v49 = vld [vmem:[#allocation2 + $0x1068] sm:$0xff] }
 0x3d1   :  { %v1816_v54 = vpack.c.bf16 %v1149_v51, %v1147_v49  ;;  %v1188_v49 = vld [vmem:[#allocation2 + $0x11b0] sm:$0xff]  ;;  %v1191_v51 = vld [vmem:[#allocation2 + $0x11c8] sm:$0xff] }
 0x3d2   :  { %v1860_v56 = vpack.c.bf16 %v1193_v52, %v1191_v51 }
 0x3d3   :  { %1775 = vmatpush1.bf16.msra.mxu1 %v1774_v57  ;;  %v1151_v57 = vld [vmem:[#allocation2 + $0x1088] sm:$0xff]  ;;  %1817 = vmatprep.subr.bf16.mxu0 %v1816_v54 }
 0x3d4   :  { %1777 = vmatprep.subr.bf16.mxu1 %v1776_v58  ;;  %v1153_v58 = vld [vmem:[#allocation2 + $0x1098] sm:$0xff]  ;;  %1819 = vmatpush1.bf16.msra.mxu0 %v1818_v59  ;;  %v1195_v59 = vld [vmem:[#allocation2 + $0x11e8] sm:$0xff] }
 0x3d5   :  { %v1820_v60 = vpack.c.bf16 %v1153_v58, %v1151_v57  ;;  %v1190_v57 = vld [vmem:[#allocation2 + $0x11c0] sm:$0xff]  ;;  %v1192_v58 = vld [vmem:[#allocation2 + $0x11d0] sm:$0xff] }
 0x3d6   :  { %v1862_v61 = vpack.c.bf16 %v1192_v58, %v1190_v57 }
 0x3d7   :  { %1779 = vmatpush1.bf16.msra.mxu1 %v1778_v63  ;;  %v1155_v63 = vld [vmem:[#allocation2 + $0x10a8] sm:$0xff]  ;;  %1821 = vmatprep.subr.bf16.mxu0 %v1820_v60  ;;  %v1197_v60 = vld [vmem:[#allocation2 + $0x11f8] sm:$0xff] }
 0x3d8   :  { %1781 = vmatprep.subr.bf16.mxu1 %v1780_v0  ;;  %v1157_v0 = vld [vmem:[#allocation2 + $0x10b8] sm:$0xff]  ;;  %1823 = vmatpush1.bf16.msra.mxu0 %v1822_v1  ;;  %v1864_v62 = vpack.c.bf16 %v1197_v60, %v1195_v59  ;;  %v1199_v1 = vld [vmem:[#allocation2 + $0x1208] sm:$0xff] }
 0x3d9   :  { %v1824_v2 = vpack.c.bf16 %v1157_v0, %v1155_v63  ;;  %v1194_v63 = vld [vmem:[#allocation2 + $0x11e0] sm:$0xff]  ;;  %v1196_v0 = vld [vmem:[#allocation2 + $0x11f0] sm:$0xff] }
 0x3da   :  { %v1866_v3 = vpack.c.bf16 %v1196_v0, %v1194_v63 }
 0x3db   :  { %1783 = vmatpush1.bf16.msra.mxu1 %v1782_v5  ;;  %v1159_v5 = vld [vmem:[#allocation2 + $0x10c8] sm:$0xff]  ;;  %1825 = vmatprep.subr.bf16.mxu0 %v1824_v2  ;;  %v1201_v2 = vld [vmem:[#allocation2 + $0x1218] sm:$0xff] }
 0x3dc   :  { %1785 = vmatprep.subr.bf16.mxu1 %v1784_v6  ;;  %v1161_v6 = vld [vmem:[#allocation2 + $0x10d8] sm:$0xff]  ;;  %1827 = vmatpush1.bf16.msra.mxu0 %v1826_v7  ;;  %v1868_v4 = vpack.c.bf16 %v1201_v2, %v1199_v1  ;;  %v1203_v7 = vld [vmem:[#allocation2 + $0x1228] sm:$0xff] }
 0x3dd   :  { %v1828_v8 = vpack.c.bf16 %v1161_v6, %v1159_v5  ;;  %v1198_v5 = vld [vmem:[#allocation2 + $0x1200] sm:$0xff]  ;;  %v1200_v6 = vld [vmem:[#allocation2 + $0x1210] sm:$0xff] }
 0x3de   :  { %v1870_v9 = vpack.c.bf16 %v1200_v6, %v1198_v5 }
 0x3df   :  { %1787 = vmatpush1.bf16.msra.mxu1 %v1786_v11  ;;  %v1163_v11 = vld [vmem:[#allocation2 + $0x10e8] sm:$0xff]  ;;  %1829 = vmatprep.subr.bf16.mxu0 %v1828_v8  ;;  %v1205_v8 = vld [vmem:[#allocation2 + $0x1238] sm:$0xff] }
 0x3e0   :  { %1789 = vmatprep.subr.bf16.mxu1 %v1788_v12  ;;  %v1165_v12 = vld [vmem:[#allocation2 + $0x10f8] sm:$0xff]  ;;  %1831 = vmatpush1.bf16.msra.mxu0 %v1830_v13  ;;  %v1872_v10 = vpack.c.bf16 %v1205_v8, %v1203_v7 }
 0x3e1   :  { %v1832_v14 = vpack.c.bf16 %v1165_v12, %v1163_v11  ;;  %v932_v11 = vld [vmem:[#allocation2 + $0x830] sm:$0xff]  ;;  %v933_v12 = vld [vmem:[#allocation2 + $0x838] sm:$0xff] }
 0x3e3   :  { %1791 = vmatpush1.bf16.msra.mxu1 %v1790_v17  ;;  %v1167_v17 = vld [vmem:[#allocation2 + $0x1108] sm:$0xff]  ;;  %1833 = vmatprep.subr.bf16.mxu0 %v1832_v14 }
 0x3e4   :  { %1793 = vmatprep.subr.bf16.mxu1 %v1792_v18  ;;  %v1169_v18 = vld [vmem:[#allocation2 + $0x1118] sm:$0xff]  ;;  %1835 = vmatpush1.bf16.msra.mxu0 %v1834_v19  ;;  %v1202_v19 = vld [vmem:[#allocation2 + $0x1220] sm:$0xff] }
 0x3e5   :  { %v1836_v20 = vpack.c.bf16 %v1169_v18, %v1167_v17 }
 0x3e7   :  { %1795 = vmatpush1.bf16.msra.mxu1 %v1794_v23  ;;  %v1171_v23 = vld [vmem:[#allocation2 + $0x1128] sm:$0xff]  ;;  %1837 = vmatprep.subr.bf16.mxu0 %v1836_v20  ;;  %v1204_v20 = vld [vmem:[#allocation2 + $0x1230] sm:$0xff] }
 0x3e8   :  { %1797 = vmatprep.subr.bf16.mxu1 %v1796_v24  ;;  %v1173_v24 = vld [vmem:[#allocation2 + $0x1138] sm:$0xff]  ;;  %1839 = vmatpush1.bf16.msra.mxu0 %v1838_v25  ;;  %v1874_v21 = vpack.c.bf16 %v1204_v20, %v1202_v19  ;;  %v1206_v25 = vld [vmem:[#allocation2 + $0x1240] sm:$0xff] }
 0x3e9   :  { %v1840_v26 = vpack.c.bf16 %v1173_v24, %v1171_v23  ;;  %v1209_v23 = vld [vmem:[#allocation2 + $0x1258] sm:$0xff] }
 0x3ea   :  { %v1876_v24 = vpack.c.bf16 %v1209_v23, %v1207_v22 }
 0x3eb   :  { %1799 = vmatpush1.bf16.msra.mxu1 %v1798_v29  ;;  %v1175_v29 = vld [vmem:[#allocation2 + $0x1148] sm:$0xff]  ;;  %1841 = vmatprep.subr.bf16.mxu0 %v1840_v26  ;;  %v1208_v26 = vld [vmem:[#allocation2 + $0x1250] sm:$0xff] }
 0x3ec   :  { %1801 = vmatprep.subr.bf16.mxu1 %v1800_v30  ;;  %v1177_v30 = vld [vmem:[#allocation2 + $0x1158] sm:$0xff]  ;;  %1843 = vmatpush1.bf16.msra.mxu0 %v1842_v31  ;;  %v1878_v27 = vpack.c.bf16 %v1208_v26, %v1206_v25 }
 0x3ed   :  { %v1844_v32 = vpack.c.bf16 %v1177_v30, %v1175_v29  ;;  %v1072_v29 = vld [vmem:[#allocation2 + $0x848] sm:$0xff] }
 0x3ef   :  { %1803 = vmatpush1.bf16.msra.mxu1 %v1802_v35  ;;  %v1179_v35 = vld [vmem:[#allocation2 + $0x1168] sm:$0xff]  ;;  %1845 = vmatprep.subr.bf16.mxu0 %v1844_v32 }
 0x3f0   :  { %1805 = vmatprep.subr.bf16.mxu1 %v1804_v36  ;;  %v1181_v36 = vld [vmem:[#allocation2 + $0x1178] sm:$0xff]  ;;  %1847 = vmatpush1.bf16.msra.mxu0 %v1846_v37 }
 0x3f1   :  { %v1848_v50 = vpack.c.bf16 %v1181_v36, %v1179_v35  ;;  %v1210_v36 = vld [vmem:[#allocation2 + $0x850] sm:$0xff]  ;;  %v1211_v37 = vld [vmem:[#allocation2 + $0x858] sm:$0xff] }
 0x3f3   :  { %1807 = vmatpush1.bf16.msra.mxu1 %v1806_v55  ;;  %v1183_v55 = vld [vmem:[#allocation2 + $0x1188] sm:$0xff]  ;;  %1849 = vmatprep.subr.bf16.mxu0 %v1848_v50 }
 0x3f4   :  { %1809 = vmatprep.subr.bf16.mxu1 %v1808_v38  ;;  %v1185_v38 = vld [vmem:[#allocation2 + $0x1198] sm:$0xff]  ;;  %1851 = vmatpush1.bf16.msra.mxu0 %v1850_v39 }
 0x3f5   :  { %v1852_v40 = vpack.c.bf16 %v1185_v38, %v1183_v55 }
 0x3f7   :  { %1811 = vmatpush1.bf16.msra.mxu1 %v1810_v41  ;;  %v1182_v41 = vld [vmem:[#allocation2 + $0x1180] sm:$0xff]  ;;  %1853 = vmatprep.subr.bf16.mxu0 %v1852_v40 }
 0x3f8   :  { %1813 = vmatprep.subr.bf16.mxu1 %v1812_v44  ;;  %v1189_v44 = vld [vmem:[#allocation2 + $0x11b8] sm:$0xff]  ;;  %v1854_v45 = vpack.c.bf16 %v1184_v42, %v1182_v41 }
 0x3f9   :  { %v1856_v47 = vpack.c.bf16 %v1189_v44, %v1187_v43 }
 0x3fa   :  { %1855 = vmatpush1.bf16.msra.mxu0 %v1854_v45 }
 0x3fb   :  { %1815 = vmatpush1.bf16.msra.mxu1 %v1814_v48  ;;  %v1186_v48 = vld [vmem:[#allocation2 + $0x11a0] sm:$0xff]  ;;  %1857 = vmatprep.subr.bf16.mxu0 %v1856_v47 }
 0x3fc   :  { %v1858_v54 = vpack.c.bf16 %v1188_v49, %v1186_v48 }
 0x3fe   :  { %1859 = vmatpush1.bf16.msra.mxu0 %v1858_v54 }
 0x3ff   :  { %1861 = vmatprep.subr.bf16.mxu0 %v1860_v56 }
 0x402   :  { %1863 = vmatpush1.bf16.msra.mxu0 %v1862_v61 }
 0x403   :  { %1865 = vmatprep.subr.bf16.mxu0 %v1864_v62 }
 0x406   :  { %1867 = vmatpush1.bf16.msra.mxu0 %v1866_v3 }
 0x407   :  { %1869 = vmatprep.subr.bf16.mxu0 %v1868_v4 }
 0x40a   :  { %1871 = vmatpush1.bf16.msra.mxu0 %v1870_v9 }
 0x40b   :  { %1873 = vmatprep.subr.bf16.mxu0 %v1872_v10 }
 0x40e   :  { %1875 = vmatpush1.bf16.msra.mxu0 %v1874_v21 }
 0x40f   :  { %1877 = vmatprep.subr.bf16.mxu0 %v1876_v24 }
 0x412   :  { %1879 = vmatpush1.bf16.msra.mxu0 %v1878_v27 }
 0x491   :  { %v1000_v13 = vpop.f32.mrb[4].mxu1 }
 0x492   :  { %v1001_v14 = vadd.f32 %v1000_v13, %v932_v11  ;;  %v1002_v15 = vpop.f32.mrb[5].mxu1 }
 0x493   :  { %v1003_v16 = vadd.f32 %v1002_v15, %v933_v12 }
 0x494   :  { %v1005_v18 = vmax.f32 %v1001_v14, 0.0 }
 0x495   :  { %v1006_v17 = vmax.f32 %v1003_v16, 0.0 }
 0x497   :  { %1137 = vmatprep.mubr.f32.mxu1 %v1006_v17 }
 0x498   :  { %1138 = vmatmul.mubr.f32.vlgmr.msra.gmra.mrb[6].mxu1 %v1005_v18 }
 0x56b   :  { %v1139_v30 = vpop.f32.mrb[6].mxu1 }
 0x56c   :  { %v1140_v31 = vadd.f32 %v1139_v30, %v1071_v28  ;;  %v1141_v32 = vpop.f32.mrb[7].mxu1 }
 0x56d   :  { %v1142_v33 = vadd.f32 %v1141_v32, %v1072_v29 }
 0x56e   :  { %v1144_v34 = vmax.f32 %v1140_v31, 0.0 }
 0x56f   :  { %v1145_v35 = vmax.f32 %v1142_v33, 0.0 }
 0x570   :  { %1283 = vst [vmem:[#allocation5] sm:$0xff] %v1144_v34 }
 0x571   :  { %1284 = vst [vmem:[#allocation5 + $0x8] sm:$0xff] %v1145_v35  ;;  %1276 = vmatprep.mubr.f32.mxu0 %v1145_v35 }
 0x572   :  { %1277 = vmatmul.mubr.f32.vlgmr.msra.gmra.mrb[2].mxu0 %v1144_v34 }
 0x645   :  { %v1278_v50 = vpop.f32.mrb[2].mxu0 }
 0x646   :  { %v1279_v53 = vadd.f32 %v1278_v50, %v1210_v36  ;;  %v1280_v46 = vpop.f32.mrb[3].mxu0 }
 0x647   :  { %v1281_v55 = vadd.f32 %v1280_v46, %v1211_v37 }
 0x648   :  { %1285 = vst [vmem:[#allocation5 + $0x10] sm:$0xff] %v1279_v53 }
 0x649   :  { %1286 = vst [vmem:[#allocation5 + $0x18] sm:$0xff] %v1281_v55 }
 0x64a   :  { %1933 = shalt.err (!%p1930_p12)
}
 0x64b   :  { %s1934_s14 = scalar_lea.hbm %s2031_s2, 512 }
 0x64c   :  { %p1935_p13 = scmp.ne.s32.totalorder %s2031_s2, %s1934_s14  ;;  %p1938_p0 = scmp.lt.u32.totalorder %s1934_s14, %s2031_s2 }
 0x64e   :  { %p1940_p1 = pnand %p1938_p0, %p1935_p13 }
 0x650   :  { %1943 = shalt.err (!%p1940_p1)
}
 0x651   :  { %1296 = dma.vmem_to_hbm [thread:$0]  %s1294_s10, 512, %s2031_s2, [#allocation4]  }
 0x652   :  { %1946 = dma.done.wait [#allocation4], 512  }
 0x653   :  { %1947 = vsyncadd [#allocation4], 4294966784 }
 0x654   :  { %1300 = vsyncpa [#allocation3], 1 }
 0x655   :  { %1301 = vsyncpa [#allocation4], 1 }

</bundles_post_ra>
